<compile_context>
chip_gen: v7x
topology: tpu7x:2x2x1
jax: 0.10.0
libtpu: 0.0.40
codegen_flags: <defaults>
</compile_context>

<pallas_src>
import functools

import jax
import jax.numpy as jnp
import numpy as np
from jax.experimental import pallas as pl
from jax.experimental.pallas import tpu as pltpu

FILTER_SIZES = (2, 3, 4, 5)
NUM_FILTERS = 64
SLAB = 128                               # vreg-aligned slab width per conv tap
TOTAL_TAPS = sum(FILTER_SIZES)           # 14
TOTAL_CH = SLAB * TOTAL_TAPS             # 1792
FEAT_DIM = SLAB * len(FILTER_SIZES)      # 512 lane-dense pooled features


def _round_up(x, m):
    return ((x + m - 1) // m) * m


def textcnn_kernel(emb_ref, wall_ref, shift_ref, out_ref, *, L):
    """Fused conv(all taps) -> folded bias/BN -> tap-align -> max-pool -> ReLU.

    emb_ref  : [TB*L, E]      bf16  pre-flattened embedded tokens (matmul LHS)
    wall_ref : [E, 1792]      bf16  all (fs, tap) conv slices, 128-lane slabs,
                                    BN scale folded in (upper 64 lanes zero)
    shift_ref: [1, 1792]      f32   folded conv bias + BN shift (first-tap slab
                                    of each filter size only, rest zero)
    out_ref  : [TB, 512]      f32   pooled features, 128 lanes per filter size
    """
    ML, E = emb_ref.shape
    TB = ML // L

    # One wide MXU matmul covering every (filter_size, tap) pair at once,
    # followed by a single lane-dense broadcast add of the folded shift.
    z = jnp.dot(emb_ref[...], wall_ref[...],
                preferred_element_type=jnp.float32)              # [TB*L, 1792]
    z = z + shift_ref[...]

    # Time-index mask, hoisted out of the filter-size loop.
    t_idx = jax.lax.broadcasted_iota(jnp.int32, (TB, L, SLAB), 1)
    neg_inf = jnp.float32(-jnp.inf)

    s = 0
    for idx, fs in enumerate(FILTER_SIZES):
        T = L - fs + 1
        # Tap k contributes z[row t+k, slab k] to conv output row t.  Align by
        # rotating the flat (batch*time) sublane axis with the XLU: shift
        # ML - k  ==  -k (mod ML), i.e. output row r picks up input row r+k.
        # Valid rows (t < T) never cross a batch boundary since t+k <= L-1;
        # rows that do (t >= L-k >= T) are masked to -inf below.
        acc = z[:, s * SLAB:(s + 1) * SLAB]
        for k in range(1, fs):
            slab = z[:, (s + k) * SLAB:(s + k + 1) * SLAB]
            acc = acc + pltpu.roll(slab, shift=ML - k, axis=0)
        s += fs

        acc3 = acc.reshape(TB, L, SLAB)                          # tile-aligned (L % 8 == 0)
        acc3 = jnp.where(t_idx < T, acc3, neg_inf)               # kill garbage rows
        pooled = jnp.maximum(jnp.max(acc3, axis=1), 0.0)         # max-pool then ReLU
        out_ref[:, idx * SLAB:(idx + 1) * SLAB] = pooled         # lane-aligned store


@functools.partial(jax.jit, static_argnames=("tb",))
def textcnn_forward(emb, w_all, shift_row, fc_w_pad, fc_b, *, tb=64):
    """emb: [B, L, E] f32.  Returns [B, 1] f32.

    VMEM per tile is dominated by the f32 z = [tb*L, 1792] matmul output
    (~112 KiB per batch row at L=16): tb=64 -> ~7 MiB, comfortably inside the
    16 MiB v5e default scoped limit (raised below anyway) and v7x's 64 MiB
    physical VMEM.  Re-derive before raising tb past ~128 or for long L.
    """
    B, L, E = emb.shape

    # Adapt the tile to the real batch (don't compute padding for tiny B), but
    # keep >= 2 grid steps when possible so the "parallel" axis can shard
    # across v7x's 2 TensorCores.
    tb = max(8, min(tb, _round_up(B, 8)))
    if _round_up(B, 8) >= 16 and _round_up(B, tb) // tb == 1:
        tb = _round_up(-(-_round_up(B, 8) // 2), 8)
    bp = _round_up(B, tb)

    emb = emb.astype(jnp.bfloat16)                   # MXU-native inputs, f32 accum
    if bp != B:
        emb = jnp.pad(emb, ((0, bp - B), (0, 0), (0, 0)))
    emb_flat = emb.reshape(bp * L, E)                # block == matmul LHS, no in-kernel reshape

    feat = pl.pallas_call(
        functools.partial(textcnn_kernel, L=L),
        out_shape=jax.ShapeDtypeStruct((bp, FEAT_DIM), jnp.float32),
        grid_spec=pltpu.PrefetchScalarGridSpec(
            num_scalar_prefetch=0,
            grid=(bp // tb,),
            in_specs=[
                pl.BlockSpec((tb * L, E), lambda i: (i, 0)),        # batch tile (flattened)
                pl.BlockSpec((E, TOTAL_CH), lambda i: (0, 0)),      # VMEM-resident weights
                pl.BlockSpec((1, TOTAL_CH), lambda i: (0, 0)),      # folded shift row
            ],
            out_specs=pl.BlockSpec((tb, FEAT_DIM), lambda i: (i, 0)),
        ),
        compiler_params=pltpu.CompilerParams(
            dimension_semantics=("parallel",),        # v7x: 2 TCs share the batch grid
            vmem_limit_bytes=64 * 1024 * 1024,        # > v5e's 16 MiB default scoped limit
        ),
    )(emb_flat, w_all, shift_row)

    # Trivial 512 -> 1 Linear in the wrapper (fc_w_pad has zeros in pad lanes).
    out = feat[:B] @ fc_w_pad.T + fc_b
    return out


def fold_params(ws_pt, cb_list, gamma, beta, run_mean, run_var, eps,
                fc_w_pt, fc_b_pt, embedding_dim):
    """Fold Conv bias + BatchNorm (eval) into a 128-lane-padded wide weight,
    a single lane-dense shift row, and a 512-wide zero-padded Linear weight."""
    bn_scale = gamma / jnp.sqrt(run_var + eps)                      # [4, 64]
    bn_shift = beta - run_mean * bn_scale                           # [4, 64]
    E = embedding_dim

    w_all = jnp.zeros((E, TOTAL_CH), jnp.float32)
    shift_row = jnp.zeros((1, TOTAL_CH), jnp.float32)
    fc_w_pad = jnp.zeros((1, FEAT_DIM), jnp.float32)

    s = 0
    for idx, fs in enumerate(FILTER_SIZES):
        w = ws_pt[idx][:, 0, :, :]                                  # [64, fs, E]
        for k in range(fs):
            wk = jnp.transpose(w[:, k, :]) * bn_scale[idx][None, :] # [E, 64], BN folded
            w_all = w_all.at[:, (s + k) * SLAB:(s + k) * SLAB + NUM_FILTERS].set(wk)
        sh = cb_list[idx] * bn_scale[idx] + bn_shift[idx]           # [64]
        shift_row = shift_row.at[0, s * SLAB:s * SLAB + NUM_FILTERS].set(sh)
        fc_w_pad = fc_w_pad.at[0, idx * SLAB:idx * SLAB + NUM_FILTERS].set(
            fc_w_pt[0, idx * NUM_FILTERS:(idx + 1) * NUM_FILTERS])
        s += fs

    return (w_all.astype(jnp.bfloat16),
            shift_row.astype(jnp.float32),
            fc_w_pad.astype(jnp.float32),
            fc_b_pt.reshape(1, 1).astype(jnp.float32))


def reference_forward(emb, ws_pt, cb_list, gamma, beta, run_mean, run_var, eps,
                      fc_w_pt, fc_b_pt):
    """Pure-JAX f32 reference with the module's (unfolded) eval-mode math."""
    bn_scale = gamma / jnp.sqrt(run_var + eps)
    bn_shift = beta - run_mean * bn_scale
    B, L, E = emb.shape
    pooled = []
    for idx, fs in enumerate(FILTER_SIZES):
        T = L - fs + 1
        w = jnp.transpose(ws_pt[idx][:, 0, :, :], (1, 2, 0))        # [fs, E, 64]
        acc = jnp.zeros((B, T, NUM_FILTERS), jnp.float32)
        for k in range(fs):
            acc = acc + jnp.einsum('bte,eo->bto', emb[:, k:k + T, :], w[k])
        acc = acc + cb_list[idx][None, None, :]
        acc = acc * bn_scale[idx][None, None, :] + bn_shift[idx][None, None, :]
        acc = jnp.maximum(acc, 0.0)
        pooled.append(jnp.max(acc, axis=1))
    feat = jnp.concatenate(pooled, axis=1)                          # [B, 256]
    return feat @ fc_w_pt.T + fc_b_pt[None, :]                      # [B, 1]


if __name__ == "__main__":
    vocab_size, embedding_dim, pad_idx = 50, 32, 0
    batch, seq_len = 2, 16

    key = jax.random.PRNGKey(0)
    keys = jax.random.split(key, 16)

    # Embedding table (padding row zeroed, as nn.Embedding(padding_idx=pad_idx)).
    emb_table = jax.random.normal(keys[0], (vocab_size, embedding_dim), jnp.float32)
    emb_table = emb_table.at[pad_idx].set(0.0)

    # Conv2d(1, 64, (fs, E)) weights/biases in PyTorch layout [64, 1, fs, E].
    ws_pt, cb_list = [], []
    for i, fs in enumerate(FILTER_SIZES):
        bound = 1.0 / np.sqrt(fs * embedding_dim)
        ws_pt.append(jax.random.uniform(keys[1 + i], (NUM_FILTERS, 1, fs, embedding_dim),
                                        jnp.float32, -bound, bound))
        cb_list.append(jax.random.uniform(keys[5 + i], (NUM_FILTERS,), jnp.float32,
                                          -bound, bound))

    # BatchNorm2d(64) params (randomized so the BN-folding path is exercised).
    eps = 1e-5
    gamma = 0.5 + jax.random.uniform(keys[12], (4, NUM_FILTERS), jnp.float32)
    run_var = 0.5 + jax.random.uniform(keys[13], (4, NUM_FILTERS), jnp.float32)
    beta = 0.1 * jax.random.normal(keys[14], (4, NUM_FILTERS), jnp.float32)
    run_mean = 0.1 * jax.random.normal(keys[15], (4, NUM_FILTERS), jnp.float32)

    # Linear(256, 1).
    fc_bound = 1.0 / np.sqrt(4 * NUM_FILTERS)
    fc_w_pt = jax.random.uniform(keys[9], (1, 4 * NUM_FILTERS), jnp.float32,
                                 -fc_bound, fc_bound)
    fc_b_pt = jax.random.uniform(keys[10], (1,), jnp.float32, -fc_bound, fc_bound)

    # Token input and embedding lookup (gather stays in plain JAX as glue).
    x = jax.random.randint(keys[11], (batch, seq_len), 0, vocab_size, jnp.int32)
    emb = emb_table[x]                                              # [B, L, E] f32

    w_all, shift_row, fc_w_pad, fc_b = fold_params(
        ws_pt, cb_list, gamma, beta, run_mean, run_var, eps,
        fc_w_pt, fc_b_pt, embedding_dim)

    out = textcnn_forward(emb, w_all, shift_row, fc_w_pad, fc_b)
    out = jax.block_until_ready(out)

    ref = reference_forward(emb, ws_pt, cb_list, gamma, beta, run_mean, run_var,
                            eps, fc_w_pt, fc_b_pt)
    ref = jax.block_until_ready(ref)

    # bf16 conv inputs with f32 accumulation vs f32 reference.
    np.testing.assert_allclose(np.asarray(out), np.asarray(ref), rtol=2e-2, atol=2e-2)
    print("KERNEL_OK")
</pallas_src>

<mosaic_0001>
module attributes {stable_mosaic.version = 11 : i64} {
  func.func @textcnn_kernel(%arg0: i32, %arg1: memref<128x32xbf16, #tpu.memory_space<vmem>>, %arg2: memref<32x1792xbf16, #tpu.memory_space<vmem>>, %arg3: memref<1x1792xf32, #tpu.memory_space<vmem>>, %arg4: memref<8x512xf32, #tpu.memory_space<vmem>>) attributes {dimension_semantics = [#tpu.dimension_semantics<parallel>], iteration_bounds = array<i64: 1>, scalar_prefetch = 0 : i64, scratch_operands = 0 : i64, tpu.core_type = #tpu.core_type<tc>, window_params = [{transform_indices = @transform_0, window_bounds = array<i64: 128, 32>}, {pipeline_mode = #tpu.pipeline_mode<synchronous>, transform_indices = @transform_1, window_bounds = array<i64: 32, 1792>}, {pipeline_mode = #tpu.pipeline_mode<synchronous>, transform_indices = @transform_2, window_bounds = array<i64: 1, 1792>}, {transform_indices = @transform_3, window_bounds = array<i64: 8, 512>}]} {
    %c0 = arith.constant 0 : index
    %c0_0 = arith.constant 0 : index
    %0 = vector.load %arg1[%c0, %c0_0] : memref<128x32xbf16, #tpu.memory_space<vmem>>, vector<128x32xbf16>
    %c0_1 = arith.constant 0 : index
    %c0_2 = arith.constant 0 : index
    %1 = vector.load %arg2[%c0_1, %c0_2] : memref<32x1792xbf16, #tpu.memory_space<vmem>>, vector<32x1792xbf16>
    %cst = arith.constant dense<0.000000e+00> : vector<128x1792xf32>
    %2 = tpu.matmul %0, %1, %cst {dimension_numbers = #tpu.dot_dimension_numbers<[1], [0], [0], [1], [0, 0, 1, 1], [], []>} : vector<128x32xbf16>, vector<32x1792xbf16>, vector<128x1792xf32> -> vector<128x1792xf32>
    %c0_3 = arith.constant 0 : index
    %c0_4 = arith.constant 0 : index
    %3 = vector.load %arg3[%c0_3, %c0_4] : memref<1x1792xf32, #tpu.memory_space<vmem>>, vector<1x1792xf32>
    %4 = vector.broadcast %3 : vector<1x1792xf32> to vector<128x1792xf32>
    %5 = arith.addf %2, %4 : vector<128x1792xf32>
    %6 = tpu.iota {dimensions = array<i32: 1>} : vector<8x16x128xi32>
    %7 = vector.extract_strided_slice %5 {offsets = [0, 0], sizes = [128, 128], strides = [1, 1]} : vector<128x1792xf32> to vector<128x128xf32>
    %8 = vector.extract_strided_slice %5 {offsets = [0, 128], sizes = [128, 128], strides = [1, 1]} : vector<128x1792xf32> to vector<128x128xf32>
    %c127_i32 = arith.constant 127 : i32
    %9 = tpu.dynamic_rotate %8 by %c127_i32 dim 0 : vector<128x128xf32>, i32 -> vector<128x128xf32>
    %10 = arith.addf %7, %9 : vector<128x128xf32>
    %11 = vector.shape_cast %10 : vector<128x128xf32> to vector<8x16x128xf32>
    %c15_i32 = arith.constant 15 : i32
    %12 = vector.broadcast %c15_i32 : i32 to vector<8x16x128xi32>
    %13 = arith.cmpi slt, %6, %12 : vector<8x16x128xi32>
    %cst_5 = arith.constant 0xFF800000 : f32
    %14 = vector.broadcast %cst_5 : f32 to vector<8x16x128xf32>
    %15 = arith.select %13, %11, %14 : vector<8x16x128xi1>, vector<8x16x128xf32>
    %cst_6 = arith.constant dense<0xFF800000> : vector<8x128xf32>
    %16 = vector.multi_reduction <maximumf>, %15, %cst_6 [1] : vector<8x16x128xf32> to vector<8x128xf32>
    %cst_7 = arith.constant 0.000000e+00 : f32
    %17 = vector.broadcast %cst_7 : f32 to vector<8x128xf32>
    %18 = arith.maximumf %16, %17 : vector<8x128xf32>
    %c0_8 = arith.constant 0 : index
    %c0_9 = arith.constant 0 : index
    %19 = vector.load %arg4[%c0_8, %c0_9] : memref<8x512xf32, #tpu.memory_space<vmem>>, vector<8x128xf32>
    tpu.vector_store %arg4[%c0_8, %c0_9], %18 {strides = array<i32>} : memref<8x512xf32, #tpu.memory_space<vmem>>, vector<8x128xf32>,
    %20 = vector.extract_strided_slice %5 {offsets = [0, 256], sizes = [128, 128], strides = [1, 1]} : vector<128x1792xf32> to vector<128x128xf32>
    %21 = vector.extract_strided_slice %5 {offsets = [0, 384], sizes = [128, 128], strides = [1, 1]} : vector<128x1792xf32> to vector<128x128xf32>
    %c127_i32_10 = arith.constant 127 : i32
    %22 = tpu.dynamic_rotate %21 by %c127_i32_10 dim 0 : vector<128x128xf32>, i32 -> vector<128x128xf32>
    %23 = arith.addf %20, %22 : vector<128x128xf32>
    %24 = vector.extract_strided_slice %5 {offsets = [0, 512], sizes = [128, 128], strides = [1, 1]} : vector<128x1792xf32> to vector<128x128xf32>
    %c126_i32 = arith.constant 126 : i32
    %25 = tpu.dynamic_rotate %24 by %c126_i32 dim 0 : vector<128x128xf32>, i32 -> vector<128x128xf32>
    %26 = arith.addf %23, %25 : vector<128x128xf32>
    %27 = vector.shape_cast %26 : vector<128x128xf32> to vector<8x16x128xf32>
    %c14_i32 = arith.constant 14 : i32
    %28 = vector.broadcast %c14_i32 : i32 to vector<8x16x128xi32>
    %29 = arith.cmpi slt, %6, %28 : vector<8x16x128xi32>
    %cst_11 = arith.constant 0xFF800000 : f32
    %30 = vector.broadcast %cst_11 : f32 to vector<8x16x128xf32>
    %31 = arith.select %29, %27, %30 : vector<8x16x128xi1>, vector<8x16x128xf32>
    %cst_12 = arith.constant dense<0xFF800000> : vector<8x128xf32>
    %32 = vector.multi_reduction <maximumf>, %31, %cst_12 [1] : vector<8x16x128xf32> to vector<8x128xf32>
    %cst_13 = arith.constant 0.000000e+00 : f32
    %33 = vector.broadcast %cst_13 : f32 to vector<8x128xf32>
    %34 = arith.maximumf %32, %33 : vector<8x128xf32>
    %c0_14 = arith.constant 0 : index
    %c128 = arith.constant 128 : index
    %35 = vector.load %arg4[%c0_14, %c128] : memref<8x512xf32, #tpu.memory_space<vmem>>, vector<8x128xf32>
    tpu.vector_store %arg4[%c0_14, %c128], %34 {strides = array<i32>} : memref<8x512xf32, #tpu.memory_space<vmem>>, vector<8x128xf32>,
    %36 = vector.extract_strided_slice %5 {offsets = [0, 640], sizes = [128, 128], strides = [1, 1]} : vector<128x1792xf32> to vector<128x128xf32>
    %37 = vector.extract_strided_slice %5 {offsets = [0, 768], sizes = [128, 128], strides = [1, 1]} : vector<128x1792xf32> to vector<128x128xf32>
    %c127_i32_15 = arith.constant 127 : i32
    %38 = tpu.dynamic_rotate %37 by %c127_i32_15 dim 0 : vector<128x128xf32>, i32 -> vector<128x128xf32>
    %39 = arith.addf %36, %38 : vector<128x128xf32>
    %40 = vector.extract_strided_slice %5 {offsets = [0, 896], sizes = [128, 128], strides = [1, 1]} : vector<128x1792xf32> to vector<128x128xf32>
    %c126_i32_16 = arith.constant 126 : i32
    %41 = tpu.dynamic_rotate %40 by %c126_i32_16 dim 0 : vector<128x128xf32>, i32 -> vector<128x128xf32>
    %42 = arith.addf %39, %41 : vector<128x128xf32>
    %43 = vector.extract_strided_slice %5 {offsets = [0, 1024], sizes = [128, 128], strides = [1, 1]} : vector<128x1792xf32> to vector<128x128xf32>
    %c125_i32 = arith.constant 125 : i32
    %44 = tpu.dynamic_rotate %43 by %c125_i32 dim 0 : vector<128x128xf32>, i32 -> vector<128x128xf32>
    %45 = arith.addf %42, %44 : vector<128x128xf32>
    %46 = vector.shape_cast %45 : vector<128x128xf32> to vector<8x16x128xf32>
    %c13_i32 = arith.constant 13 : i32
    %47 = vector.broadcast %c13_i32 : i32 to vector<8x16x128xi32>
    %48 = arith.cmpi slt, %6, %47 : vector<8x16x128xi32>
    %cst_17 = arith.constant 0xFF800000 : f32
    %49 = vector.broadcast %cst_17 : f32 to vector<8x16x128xf32>
    %50 = arith.select %48, %46, %49 : vector<8x16x128xi1>, vector<8x16x128xf32>
    %cst_18 = arith.constant dense<0xFF800000> : vector<8x128xf32>
    %51 = vector.multi_reduction <maximumf>, %50, %cst_18 [1] : vector<8x16x128xf32> to vector<8x128xf32>
    %cst_19 = arith.constant 0.000000e+00 : f32
    %52 = vector.broadcast %cst_19 : f32 to vector<8x128xf32>
    %53 = arith.maximumf %51, %52 : vector<8x128xf32>
    %c0_20 = arith.constant 0 : index
    %c256 = arith.constant 256 : index
    %54 = vector.load %arg4[%c0_20, %c256] : memref<8x512xf32, #tpu.memory_space<vmem>>, vector<8x128xf32>
    tpu.vector_store %arg4[%c0_20, %c256], %53 {strides = array<i32>} : memref<8x512xf32, #tpu.memory_space<vmem>>, vector<8x128xf32>,
    %55 = vector.extract_strided_slice %5 {offsets = [0, 1152], sizes = [128, 128], strides = [1, 1]} : vector<128x1792xf32> to vector<128x128xf32>
    %56 = vector.extract_strided_slice %5 {offsets = [0, 1280], sizes = [128, 128], strides = [1, 1]} : vector<128x1792xf32> to vector<128x128xf32>
    %c127_i32_21 = arith.constant 127 : i32
    %57 = tpu.dynamic_rotate %56 by %c127_i32_21 dim 0 : vector<128x128xf32>, i32 -> vector<128x128xf32>
    %58 = arith.addf %55, %57 : vector<128x128xf32>
    %59 = vector.extract_strided_slice %5 {offsets = [0, 1408], sizes = [128, 128], strides = [1, 1]} : vector<128x1792xf32> to vector<128x128xf32>
    %c126_i32_22 = arith.constant 126 : i32
    %60 = tpu.dynamic_rotate %59 by %c126_i32_22 dim 0 : vector<128x128xf32>, i32 -> vector<128x128xf32>
    %61 = arith.addf %58, %60 : vector<128x128xf32>
    %62 = vector.extract_strided_slice %5 {offsets = [0, 1536], sizes = [128, 128], strides = [1, 1]} : vector<128x1792xf32> to vector<128x128xf32>
    %c125_i32_23 = arith.constant 125 : i32
    %63 = tpu.dynamic_rotate %62 by %c125_i32_23 dim 0 : vector<128x128xf32>, i32 -> vector<128x128xf32>
    %64 = arith.addf %61, %63 : vector<128x128xf32>
    %65 = vector.extract_strided_slice %5 {offsets = [0, 1664], sizes = [128, 128], strides = [1, 1]} : vector<128x1792xf32> to vector<128x128xf32>
    %c124_i32 = arith.constant 124 : i32
    %66 = tpu.dynamic_rotate %65 by %c124_i32 dim 0 : vector<128x128xf32>, i32 -> vector<128x128xf32>
    %67 = arith.addf %64, %66 : vector<128x128xf32>
    %68 = vector.shape_cast %67 : vector<128x128xf32> to vector<8x16x128xf32>
    %c12_i32 = arith.constant 12 : i32
    %69 = vector.broadcast %c12_i32 : i32 to vector<8x16x128xi32>
    %70 = arith.cmpi slt, %6, %69 : vector<8x16x128xi32>
    %cst_24 = arith.constant 0xFF800000 : f32
    %71 = vector.broadcast %cst_24 : f32 to vector<8x16x128xf32>
    %72 = arith.select %70, %68, %71 : vector<8x16x128xi1>, vector<8x16x128xf32>
    %cst_25 = arith.constant dense<0xFF800000> : vector<8x128xf32>
    %73 = vector.multi_reduction <maximumf>, %72, %cst_25 [1] : vector<8x16x128xf32> to vector<8x128xf32>
    %cst_26 = arith.constant 0.000000e+00 : f32
    %74 = vector.broadcast %cst_26 : f32 to vector<8x128xf32>
    %75 = arith.maximumf %73, %74 : vector<8x128xf32>
    %c0_27 = arith.constant 0 : index
    %c384 = arith.constant 384 : index
    %76 = vector.load %arg4[%c0_27, %c384] : memref<8x512xf32, #tpu.memory_space<vmem>>, vector<8x128xf32>
    tpu.vector_store %arg4[%c0_27, %c384], %75 {strides = array<i32>} : memref<8x512xf32, #tpu.memory_space<vmem>>, vector<8x128xf32>,
    return
  }
  func.func @transform_0(%arg0: i32) -> (i32, i32) {
    %c0_i32 = arith.constant 0 : i32
    %c0_i32_0 = arith.constant 0 : i32
    return %arg0, %c0_i32 : i32, i32
  }
  func.func @transform_1(%arg0: i32) -> (i32, i32) {
    %c0_i32 = arith.constant 0 : i32
    %c0_i32_0 = arith.constant 0 : i32
    %c0_i32_1 = arith.constant 0 : i32
    return %c0_i32, %c0_i32_0 : i32, i32
  }
  func.func @transform_2(%arg0: i32) -> (i32, i32) {
    %c0_i32 = arith.constant 0 : i32
    %c0_i32_0 = arith.constant 0 : i32
    %c0_i32_1 = arith.constant 0 : i32
    return %c0_i32, %c0_i32_0 : i32, i32
  }
  func.func @transform_3(%arg0: i32) -> (i32, i32) {
    %c0_i32 = arith.constant 0 : i32
    %c0_i32_0 = arith.constant 0 : i32
    return %arg0, %c0_i32 : i32, i32
  }
}

</mosaic_0001>

<bundles_post_ra>
// kernel: textcnn_forward.1
= control target key start
LH: loop header
LB: loop body
LE: loop exit
PB: predicated region body
PF: predicated region fallthrough
CT: control target
= control target key end

     0   :  { %8 = vsyncpa [#allocation3], 0  ;;  %s3748_s0 = inlined_call_operand.hbm [shape: bf16[128,32], index: 0, kind: input, shape index: {}]   ;;  %s3749_s1 = inlined_call_operand.hbm [shape: bf16[32,1792], index: 1, kind: input, shape index: {}]   ;;  %s3750_s2 = inlined_call_operand.hbm [shape: f32[1,1792], index: 2, kind: input, shape index: {}]   ;;  %s3751_s3 = inlined_call_operand.hbm [shape: f32[8,512], index: 3, kind: output, shape index: {}]  }
   0x1   :  { %9 = vsyncpa [#allocation6], 0 }
   0x2   :  { %10 = vsyncpa [#allocation4], 0  ;;  %s2325_s12 = smov [#allocation5]   ;;  %s2231_s16 = scalar_lea.hbm %s3749_s1, 3584 }
   0x3   :  { %s28_s13 = sshll.u32 %s2325_s12, 4  ;;  %p2232_p0 = scmp.ne.s32.totalorder %s3749_s1, %s2231_s16  ;;  %s29_s13 = int_to_ptr.vmem [resolvable:$true] %s28_s13 }
   0x4   :  { %p2235_p1 = scmp.lt.u32.totalorder %s2231_s16, %s3749_s1 }
   0x6   :  { %p2237_p2 = pnand %p2235_p1, %p2232_p0 }
   0x8   :  { %2240 = shalt.err (!%p2237_p2)
}
   0x9   :  { %s2241_s21 = scalar_lea.vmem %s29_s13, 3584  ;;  %p2246_p4 = scmp.lt.s32.totalorder %s29_s13, %s29_s13 }
   0xa   :  { %p2242_p3 = scmp.ne.s32.totalorder %s29_s13, %s2241_s21  ;;  %p2247_p5 = scmp.lt.s32.totalorder %s2241_s21, %s2241_s21 }
   0xc   :  { %p2248_p6 = por %p2247_p5, %p2246_p4 }
   0xe   :  { %p2249_p7 = pnand %p2248_p6, %p2242_p3 }
  0x10   :  { %2252 = shalt.err (!%p2249_p7)
}
  0x11   :  { %s2326_s22 = smov 896   ;;  %s2327_s23 = smov 56  }
  0x12   :  { %34 = dma.hbm_to_vmem [thread:$0]  %s3749_s1, 3584, %s29_s13, [#allocation6], %s2326_s22, %s2326_s22, %s2327_s23  }
  0x13   :  { %s2328_s26 = smov [#allocation2]   ;;  %s2253_s30 = scalar_lea.hbm %s3748_s0, 1024 }
  0x14   :  { %s16_s27 = sshll.u32 %s2328_s26, 4  ;;  %p2254_p8 = scmp.ne.s32.totalorder %s3748_s0, %s2253_s30  ;;  %s17_s27 = int_to_ptr.vmem [resolvable:$true] %s16_s27 }
  0x15   :  { %p2257_p9 = scmp.lt.u32.totalorder %s2253_s30, %s3748_s0 }
  0x17   :  { %p2259_p10 = pnand %p2257_p9, %p2254_p8 }
  0x19   :  { %2262 = shalt.err (!%p2259_p10)
}
  0x1a   :  { %s2263_s8 = scalar_lea.vmem %s17_s27, 1024  ;;  %p2268_p12 = scmp.lt.s32.totalorder %s17_s27, %s17_s27 }
  0x1b   :  { %p2264_p11 = scmp.ne.s32.totalorder %s17_s27, %s2263_s8  ;;  %p2269_p13 = scmp.lt.s32.totalorder %s2263_s8, %s2263_s8 }
  0x1d   :  { %p2270_p0 = por %p2269_p13, %p2268_p12 }
  0x1f   :  { %p2271_p1 = pnand %p2270_p0, %p2264_p11 }
  0x21   :  { %2274 = shalt.err (!%p2271_p1)
}
  0x22   :  { %s2329_s1 = smov 64   ;;  %s2330_s9 = smov 4  }
  0x23   :  { %22 = dma.hbm_to_vmem [thread:$0]  %s3748_s0, 1024, %s17_s27, [#allocation3], %s2329_s1, %s2329_s1, %s2330_s9  }
  0x24   :  { %s2331_s12 = smov [#allocation7]   ;;  %s2275_s16 = scalar_lea.hbm %s3750_s2, 224 }
  0x25   :  { %s41_s13 = sshll.u32 %s2331_s12, 4  ;;  %p2276_p2 = scmp.ne.s32.totalorder %s3750_s2, %s2275_s16  ;;  %s42_s13 = int_to_ptr.vmem [resolvable:$true] %s41_s13 }
  0x26   :  { %p2279_p3 = scmp.lt.u32.totalorder %s2275_s16, %s3750_s2 }
  0x28   :  { %p2281_p4 = pnand %p2279_p3, %p2276_p2 }
  0x2a   :  { %2284 = shalt.err (!%p2281_p4)
}
  0x2b   :  { %s2285_s21 = scalar_lea.vmem %s42_s13, 224  ;;  %p2290_p6 = scmp.lt.s32.totalorder %s42_s13, %s42_s13 }
  0x2c   :  { %p2286_p5 = scmp.ne.s32.totalorder %s42_s13, %s2285_s21  ;;  %p2291_p7 = scmp.lt.s32.totalorder %s2285_s21, %s2285_s21 }
  0x2e   :  { %p2292_p8 = por %p2291_p7, %p2290_p6 }
  0x30   :  { %p2293_p9 = pnand %p2292_p8, %p2286_p5 }
  0x32   :  { %2296 = shalt.err (!%p2293_p9)
}
  0x33   :  { %44 = dma.hbm_to_vmem [thread:$0]  %s3750_s2, 224, %s42_s13, [#allocation6]  }
  0x34   :  { %2319 = dma.done.wait [#allocation3], 1024  }
  0x35   :  { %2320 = vsyncadd [#allocation3], 4294966272 }
  0x36   :  { %2321 = dma.done.wait [#allocation6], 3808  }
  0x37   :  { %2322 = vsyncadd [#allocation6], 4294963488  ;;  %v2332_v0 = vmov 0   ;;  %v2180_v1 = vld [vmem:[#allocation5 + $0x4] ss:$56 sps:$4 sm:$0xff]   ;;  %vm353_vm0 = vcmask 261120   ;;  %v103_v37 = vlaneseq }
  0x38   :  { %410 = vmatprep.mubr.bf16.mxu0 %v2332_v0  ;;  %450 = vmatprep.mubr.bf16.mxu1 %v2332_v0  ;;  %v2182_v2 = vld [vmem:[#allocation5] ss:$56 sps:$4 sm:$0xff]   ;;  %v2183_v3 = vld [vmem:[#allocation5 + $0x74] ss:$56 sps:$4 sm:$0xff]   ;;  %v2185_v4 = vld [vmem:[#allocation5 + $0x70] ss:$56 sps:$4 sm:$0xff]  }
  0x39   :  { %378 = vmatprep.subr.bf16.mxu0 %v2180_v1  ;;  %2167 = vmatprep.subr.bf16.mxu1 %v2180_v1  ;;  %v2392_v5 = vld [vmem:[#allocation2] sm:$0xff]   ;;  %v2191_v9 = vld [vmem:[#allocation5 + $0x10] ss:$56 sps:$4 sm:$0xff]   ;;  %v2193_v10 = vld [vmem:[#allocation5 + $0x14] ss:$56 sps:$4 sm:$0xff]   ;;  %v2564_v38 = vshrl.u32 %v103_v37, 7 }
  0x3a   :  { %379 = vmatpush1.bf16.msra.mxu0 %v2182_v2  ;;  %2169 = vmatpush1.bf16.msra.mxu1 %v2182_v2  ;;  %v2394_v6 = vld [vmem:[#allocation2 + $0x20] sm:$0xff]   ;;  %v2402_v11 = vld [vmem:[#allocation2 + $0x8] sm:$0xff]   ;;  %v2198_v12 = vld [vmem:[#allocation5 + $0x78] ss:$56 sps:$4 sm:$0xff]   ;;  %vm1311_vm3 = vcmask 1041409   ;;  %vm1313_vm5 = vcmask 1042434  }
  0x3b   :  { %380 = vmatprep.subr.bf16.mxu0 %v2183_v3  ;;  %2168 = vmatprep.subr.bf16.mxu1 %v2183_v3  ;;  %v2188_v7 = vld [vmem:[#allocation5 + $0x8] ss:$56 sps:$4 sm:$0xff]   ;;  %v2190_v8 = vld [vmem:[#allocation5 + $0xc] ss:$56 sps:$4 sm:$0xff]   ;;  %v2200_v13 = vld [vmem:[#allocation5 + $0x7c] ss:$56 sps:$4 sm:$0xff]  }
  0x3c   :  { %v2201_v14 = vld [vmem:[#allocation5 + $0x80] ss:$56 sps:$4 sm:$0xff]   ;;  %v2203_v15 = vld [vmem:[#allocation5 + $0x84] ss:$56 sps:$4 sm:$0xff]   ;;  %v2404_v16 = vld [vmem:[#allocation2 + $0x28] sm:$0xff]   ;;  %v109_v39 = vsub.s32 1, %v2564_v38 }
  0x3d   :  { %v2208_v17 = vld [vmem:[#allocation5 + $0x1c] ss:$56 sps:$4 sm:$0xff]   ;;  %v2206_v23 = vld [vmem:[#allocation5 + $0x18] ss:$56 sps:$4 sm:$0xff]   ;;  %v2214_v25 = vld [vmem:[#allocation5 + $0x8c] ss:$56 sps:$4 sm:$0xff]  }
  0x3e   :  { %381 = vmatpush1.bf16.msra.mxu0 %v2185_v4  ;;  %2170 = vmatpush1.bf16.msra.mxu1 %v2185_v4  ;;  %v2211_v18 = vld [vmem:[#allocation5 + $0x24] ss:$56 sps:$4 sm:$0xff]   ;;  %v2412_v19 = vld [vmem:[#allocation2 + $0x10] sm:$0xff]   ;;  %v2209_v24 = vld [vmem:[#allocation5 + $0x20] ss:$56 sps:$4 sm:$0xff]   ;;  %v105_v42 = vsub.s32 0, %v2564_v38 }
  0x3f   :  { %491 = vmatprep.subr.bf16.mxu1 %v2190_v8  ;;  %604 = vmatprep.subr.bf16.mxu0 %v2193_v10  ;;  %v2414_v20 = vld [vmem:[#allocation2 + $0x30] sm:$0xff]   ;;  %v2422_v21 = vld [vmem:[#allocation2 + $0x18] sm:$0xff]   ;;  %v2212_v27 = vld [vmem:[#allocation5 + $0x88] ss:$56 sps:$4 sm:$0xff]   ;;  %vm1188_vm1 = vcmp.lt.s32.totalorder %v2564_v38, 7  ;;  %v2602_v60 = vadd.s32 8, %v2564_v38 }
  0x40   :  { %v2424_v22 = vld [vmem:[#allocation2 + $0x38] sm:$0xff]   ;;  %v2217_v26 = vld [vmem:[#allocation5 + $0x94] ss:$56 sps:$4 sm:$0xff]   ;;  %v2215_v28 = vld [vmem:[#allocation5 + $0x90] ss:$56 sps:$4 sm:$0xff]   ;;  %v3757_v63 = vsub.s32 2, %v2564_v38 }
  0x41   :  { %2111 = vmatmul.mubr.msk.bf16.vlgmr.msra.gmra.mrb[0].mxu0 %vm353_vm0, %v2392_v5  ;;  %2115 = vmatmul.mubr.msk.bf16.vlgmr.msra.gmra.mrb[0].mxu1 %vm353_vm0, %v2394_v6  ;;  %v2220_v29 = vld [vmem:[#allocation5 + $0x2c] ss:$56 sps:$4 sm:$0xff]   ;;  %v2218_v31 = vld [vmem:[#allocation5 + $0x28] ss:$56 sps:$4 sm:$0xff]   ;;  %v2226_v33 = vld [vmem:[#allocation5 + $0x9c] ss:$56 sps:$4 sm:$0xff]  }
  0x42   :  { %492 = vmatpush1.bf16.msra.mxu1 %v2188_v7  ;;  %605 = vmatpush1.bf16.msra.mxu0 %v2191_v9  ;;  %v2223_v30 = vld [vmem:[#allocation5 + $0x34] ss:$56 sps:$4 sm:$0xff]   ;;  %v2221_v32 = vld [vmem:[#allocation5 + $0x30] ss:$56 sps:$4 sm:$0xff]   ;;  %v2229_v34 = vld [vmem:[#allocation5 + $0xa4] ss:$56 sps:$4 sm:$0xff]  }
  0x43   :  { %420 = vmatprep.mubr.bf16.mxu0 %v2332_v0  ;;  %460 = vmatprep.mubr.bf16.mxu1 %v2332_v0  ;;  %v2224_v35 = vld [vmem:[#allocation5 + $0x98] ss:$56 sps:$4 sm:$0xff]   ;;  %v2567_v40 = vld [vmem:[#allocation7] sm:$0xff]  ;;  %v3753_v9 = vsub.s32 4, %v2564_v38  ;;  %v3752_v10 = vsub.s32 5, %v2564_v38  ;;  %vm1222_vm2 = vcmp.lt.s32.totalorder %v2602_v60, 15 }
  0x44   :  { %493 = vmatprep.subr.bf16.mxu1 %v2200_v13  ;;  %606 = vmatprep.subr.bf16.mxu0 %v2203_v15  ;;  %v2227_v36 = vld [vmem:[#allocation5 + $0xa0] ss:$56 sps:$4 sm:$0xff]   ;;  %v2576_v41 = vrot.slane %v2567_v40, %v109_v39  ;;  %v2590_v51 = vrot.slane %v2567_v40, %v105_v42  ;;  %v2653_v37 = vld [vmem:[#allocation7 + $0x8] sm:$0x3f]  ;;  %vm1391_vm4 = vcmp.lt.s32.totalorder %v2564_v38, 6  ;;  %vm1425_vm6 = vcmp.lt.s32.totalorder %v2602_v60, 14 }
  0x45   :  { %vm1635_vm7 = vcmp.lt.s32.totalorder %v2564_v38, 5  ;;  %vm1669_vm8 = vcmp.lt.s32.totalorder %v2602_v60, 13  ;;  %vm1927_vm9 = vcmp.lt.s32.totalorder %v2564_v38, 4  ;;  %vm1961_vm10 = vcmp.lt.s32.totalorder %v2602_v60, 12  ;;  %s2333_s2 = smov [#allocation8]  }
  0x46   :  { %494 = vmatpush1.bf16.msra.mxu1 %v2198_v12  ;;  %607 = vmatpush1.bf16.msra.mxu0 %v2201_v14  ;;  %vm1315_vm11 = vcmask 1043459   ;;  %vm1317_vm12 = vcmask 1044484   ;;  %vm1319_vm13 = vcmask 1045509   ;;  %vm1321_vm14 = vcmask 1046534   ;;  %s2065_s23 = sshll.u32 %s2333_s2, 4  ;;  %s2066_s23 = int_to_ptr.vmem [resolvable:$true] %s2065_s23 }
  0x47   :  { %717 = vmatprep.subr.bf16.mxu1 %v2208_v17  ;;  %830 = vmatprep.subr.bf16.mxu0 %v2211_v18  ;;  %v2624_v17 = vrot.slane %v2567_v40, %v3757_v63  ;;  %vm1323_vm15 = vcmask 1047559   ;;  %s2297_s24 = scalar_lea.vmem %s2066_s23, 512  ;;  %p2302_p11 = scmp.lt.s32.totalorder %s2066_s23, %s2066_s23 }
  0x48   :  { %p2298_p10 = scmp.ne.s32.totalorder %s2066_s23, %s2297_s24  ;;  %p2303_p12 = scmp.lt.s32.totalorder %s2297_s24, %s2297_s24 }
  0x49   :  { %2112 = vmatmul.mubr.msk.bf16.gmra.mrb[4].mxu0 %vm353_vm0, %v2402_v11  ;;  %2116 = vmatmul.mubr.msk.bf16.gmra.mrb[4].mxu1 %vm353_vm0, %v2404_v16 }
  0x4a   :  { %430 = vmatprep.mubr.bf16.mxu0 %v2332_v0  ;;  %470 = vmatprep.mubr.bf16.mxu1 %v2332_v0  ;;  %p2304_p13 = por %p2303_p12, %p2302_p11 }
  0x4c   :  { %p2305_p0 = pnand %p2304_p13, %p2298_p10 }
  0x51   :  { %2113 = vmatmul.mubr.msk.bf16.gmra.mrb[8].mxu0 %vm353_vm0, %v2412_v19  ;;  %2117 = vmatmul.mubr.msk.bf16.gmra.mrb[8].mxu1 %vm353_vm0, %v2414_v20 }
  0x52   :  { %440 = vmatprep.mubr.bf16.mxu0 %v2332_v0  ;;  %480 = vmatprep.mubr.bf16.mxu1 %v2332_v0 }
  0x59   :  { %2114 = vmatmul.mubr.msk.bf16.gmra.mrb[12].mxu0 %vm353_vm0, %v2422_v21  ;;  %2118 = vmatmul.mubr.msk.bf16.gmra.mrb[12].mxu1 %vm353_vm0, %v2424_v22 }
  0x5a   :  { %523 = vmatprep.mubr.bf16.mxu1 %v2332_v0  ;;  %636 = vmatprep.mubr.bf16.mxu0 %v2332_v0 }
  0x61   :  { %2119 = vmatmul.mubr.msk.bf16.vlgmr.msra.gmra.mrb[16].mxu1 %vm353_vm0, %v2392_v5  ;;  %2127 = vmatmul.mubr.msk.bf16.vlgmr.msra.gmra.mrb[16].mxu0 %vm353_vm0, %v2392_v5 }
  0x62   :  { %718 = vmatpush1.bf16.msra.mxu1 %v2206_v23  ;;  %831 = vmatpush1.bf16.msra.mxu0 %v2209_v24 }
  0x63   :  { %533 = vmatprep.mubr.bf16.mxu1 %v2332_v0  ;;  %646 = vmatprep.mubr.bf16.mxu0 %v2332_v0 }
  0x64   :  { %719 = vmatprep.subr.bf16.mxu1 %v2214_v25  ;;  %832 = vmatprep.subr.bf16.mxu0 %v2217_v26 }
  0x66   :  { %720 = vmatpush1.bf16.msra.mxu1 %v2212_v27  ;;  %833 = vmatpush1.bf16.msra.mxu0 %v2215_v28  ;;  %v2640_v27 = vrot.slane %v2567_v40, %v3753_v9  ;;  %v2645_v28 = vrot.slane %v2567_v40, %v3752_v10 }
  0x67   :  { %943 = vmatprep.subr.bf16.mxu1 %v2220_v29  ;;  %1056 = vmatprep.subr.bf16.mxu0 %v2223_v30 }
  0x69   :  { %2120 = vmatmul.mubr.msk.bf16.gmra.mrb[20].mxu1 %vm353_vm0, %v2402_v11  ;;  %2128 = vmatmul.mubr.msk.bf16.gmra.mrb[20].mxu0 %vm353_vm0, %v2402_v11 }
  0x6a   :  { %543 = vmatprep.mubr.bf16.mxu1 %v2332_v0  ;;  %656 = vmatprep.mubr.bf16.mxu0 %v2332_v0 }
  0x71   :  { %2121 = vmatmul.mubr.msk.bf16.gmra.mrb[24].mxu1 %vm353_vm0, %v2412_v19  ;;  %2129 = vmatmul.mubr.msk.bf16.gmra.mrb[24].mxu0 %vm353_vm0, %v2412_v19 }
  0x72   :  { %553 = vmatprep.mubr.bf16.mxu1 %v2332_v0  ;;  %666 = vmatprep.mubr.bf16.mxu0 %v2332_v0 }
  0x79   :  { %2122 = vmatmul.mubr.msk.bf16.gmra.mrb[28].mxu1 %vm353_vm0, %v2422_v21  ;;  %2130 = vmatmul.mubr.msk.bf16.gmra.mrb[28].mxu0 %vm353_vm0, %v2422_v21 }
  0x7a   :  { %563 = vmatprep.mubr.bf16.mxu1 %v2332_v0  ;;  %676 = vmatprep.mubr.bf16.mxu0 %v2332_v0 }
  0x81   :  { %2123 = vmatmul.mubr.msk.bf16.gmra.mrb[32].mxu1 %vm353_vm0, %v2394_v6  ;;  %2131 = vmatmul.mubr.msk.bf16.gmra.mrb[32].mxu0 %vm353_vm0, %v2394_v6 }
  0x82   :  { %573 = vmatprep.mubr.bf16.mxu1 %v2332_v0  ;;  %686 = vmatprep.mubr.bf16.mxu0 %v2332_v0 }
  0x89   :  { %2124 = vmatmul.mubr.msk.bf16.gmra.mrb[36].mxu1 %vm353_vm0, %v2404_v16  ;;  %2132 = vmatmul.mubr.msk.bf16.gmra.mrb[36].mxu0 %vm353_vm0, %v2404_v16 }
  0x8a   :  { %583 = vmatprep.mubr.bf16.mxu1 %v2332_v0  ;;  %696 = vmatprep.mubr.bf16.mxu0 %v2332_v0 }
  0x91   :  { %2125 = vmatmul.mubr.msk.bf16.gmra.mrb[40].mxu1 %vm353_vm0, %v2414_v20  ;;  %2133 = vmatmul.mubr.msk.bf16.gmra.mrb[40].mxu0 %vm353_vm0, %v2414_v20 }
  0x92   :  { %593 = vmatprep.mubr.bf16.mxu1 %v2332_v0  ;;  %706 = vmatprep.mubr.bf16.mxu0 %v2332_v0 }
  0x99   :  { %2126 = vmatmul.mubr.msk.bf16.gmra.mrb[44].mxu1 %vm353_vm0, %v2424_v22  ;;  %2134 = vmatmul.mubr.msk.bf16.gmra.mrb[44].mxu0 %vm353_vm0, %v2424_v22 }
  0x9a   :  { %749 = vmatprep.mubr.bf16.mxu1 %v2332_v0  ;;  %862 = vmatprep.mubr.bf16.mxu0 %v2332_v0 }
  0xa1   :  { %2135 = vmatmul.mubr.msk.bf16.vlgmr.msra.gmra.mrb[48].mxu1 %vm353_vm0, %v2392_v5  ;;  %2143 = vmatmul.mubr.msk.bf16.vlgmr.msra.gmra.mrb[48].mxu0 %vm353_vm0, %v2392_v5 }
  0xa2   :  { %944 = vmatpush1.bf16.msra.mxu1 %v2218_v31  ;;  %1057 = vmatpush1.bf16.msra.mxu0 %v2221_v32 }
  0xa3   :  { %759 = vmatprep.mubr.bf16.mxu1 %v2332_v0  ;;  %872 = vmatprep.mubr.bf16.mxu0 %v2332_v0 }
  0xa4   :  { %945 = vmatprep.subr.bf16.mxu1 %v2226_v33  ;;  %1058 = vmatprep.subr.bf16.mxu0 %v2229_v34 }
  0xa6   :  { %946 = vmatpush1.bf16.msra.mxu1 %v2224_v35  ;;  %1059 = vmatpush1.bf16.msra.mxu0 %v2227_v36 }
  0xa9   :  { %2136 = vmatmul.mubr.msk.bf16.gmra.mrb[52].mxu1 %vm353_vm0, %v2402_v11  ;;  %2144 = vmatmul.mubr.msk.bf16.gmra.mrb[52].mxu0 %vm353_vm0, %v2402_v11 }
  0xaa   :  { %769 = vmatprep.mubr.bf16.mxu1 %v2332_v0  ;;  %882 = vmatprep.mubr.bf16.mxu0 %v2332_v0 }
  0xb1   :  { %2137 = vmatmul.mubr.msk.bf16.gmra.mrb[56].mxu1 %vm353_vm0, %v2412_v19  ;;  %2145 = vmatmul.mubr.msk.bf16.gmra.mrb[56].mxu0 %vm353_vm0, %v2412_v19 }
  0xb2   :  { %779 = vmatprep.mubr.bf16.mxu1 %v2332_v0  ;;  %892 = vmatprep.mubr.bf16.mxu0 %v2332_v0 }
  0xb9   :  { %2138 = vmatmul.mubr.msk.bf16.gmra.mrb[60].mxu1 %vm353_vm0, %v2422_v21  ;;  %2146 = vmatmul.mubr.msk.bf16.gmra.mrb[60].mxu0 %vm353_vm0, %v2422_v21 }
  0xba   :  { %789 = vmatprep.mubr.bf16.mxu1 %v2332_v0  ;;  %902 = vmatprep.mubr.bf16.mxu0 %v2332_v0 }
  0xc1   :  { %2139 = vmatmul.mubr.msk.bf16.gmra.mrb[64].mxu1 %vm353_vm0, %v2394_v6  ;;  %2147 = vmatmul.mubr.msk.bf16.gmra.mrb[64].mxu0 %vm353_vm0, %v2394_v6 }
  0xc2   :  { %799 = vmatprep.mubr.bf16.mxu1 %v2332_v0  ;;  %912 = vmatprep.mubr.bf16.mxu0 %v2332_v0 }
  0xc9   :  { %2140 = vmatmul.mubr.msk.bf16.gmra.mrb[68].mxu1 %vm353_vm0, %v2404_v16  ;;  %2148 = vmatmul.mubr.msk.bf16.gmra.mrb[68].mxu0 %vm353_vm0, %v2404_v16 }
  0xca   :  { %809 = vmatprep.mubr.bf16.mxu1 %v2332_v0  ;;  %922 = vmatprep.mubr.bf16.mxu0 %v2332_v0 }
  0xd1   :  { %2141 = vmatmul.mubr.msk.bf16.gmra.mrb[72].mxu1 %vm353_vm0, %v2414_v20  ;;  %2149 = vmatmul.mubr.msk.bf16.gmra.mrb[72].mxu0 %vm353_vm0, %v2414_v20 }
  0xd2   :  { %819 = vmatprep.mubr.bf16.mxu1 %v2332_v0  ;;  %932 = vmatprep.mubr.bf16.mxu0 %v2332_v0 }
  0xd9   :  { %2142 = vmatmul.mubr.msk.bf16.gmra.mrb[76].mxu1 %vm353_vm0, %v2424_v22  ;;  %2150 = vmatmul.mubr.msk.bf16.gmra.mrb[76].mxu0 %vm353_vm0, %v2424_v22 }
  0xda   :  { %975 = vmatprep.mubr.bf16.mxu1 %v2332_v0  ;;  %1088 = vmatprep.mubr.bf16.mxu0 %v2332_v0 }
  0xe1   :  { %2151 = vmatmul.mubr.msk.bf16.vlgmr.msra.gmra.mrb[80].mxu1 %vm353_vm0, %v2392_v5  ;;  %2159 = vmatmul.mubr.msk.bf16.vlgmr.msra.gmra.mrb[80].mxu0 %vm353_vm0, %v2392_v5 }
  0xe2   :  { %985 = vmatprep.mubr.bf16.mxu1 %v2332_v0  ;;  %1098 = vmatprep.mubr.bf16.mxu0 %v2332_v0 }
  0xe9   :  { %2152 = vmatmul.mubr.msk.bf16.gmra.mrb[84].mxu1 %vm353_vm0, %v2402_v11  ;;  %2160 = vmatmul.mubr.msk.bf16.gmra.mrb[84].mxu0 %vm353_vm0, %v2402_v11 }
  0xea   :  { %995 = vmatprep.mubr.bf16.mxu1 %v2332_v0  ;;  %1108 = vmatprep.mubr.bf16.mxu0 %v2332_v0 }
  0xf1   :  { %2153 = vmatmul.mubr.msk.bf16.gmra.mrb[88].mxu1 %vm353_vm0, %v2412_v19  ;;  %2161 = vmatmul.mubr.msk.bf16.gmra.mrb[88].mxu0 %vm353_vm0, %v2412_v19  ;;  %v129_v19 = vsub.s32 6, %v2564_v38 }
  0xf2   :  { %1005 = vmatprep.mubr.bf16.mxu1 %v2332_v0  ;;  %1118 = vmatprep.mubr.bf16.mxu0 %v2332_v0 }
  0xf9   :  { %2154 = vmatmul.mubr.msk.bf16.gmra.mrb[92].mxu1 %vm353_vm0, %v2422_v21  ;;  %2162 = vmatmul.mubr.msk.bf16.gmra.mrb[92].mxu0 %vm353_vm0, %v2422_v21 }
  0xfa   :  { %1015 = vmatprep.mubr.bf16.mxu1 %v2332_v0  ;;  %1128 = vmatprep.mubr.bf16.mxu0 %v2332_v0 }
 0x101   :  { %2155 = vmatmul.mubr.msk.bf16.gmra.mrb[96].mxu1 %vm353_vm0, %v2394_v6  ;;  %2163 = vmatmul.mubr.msk.bf16.gmra.mrb[96].mxu0 %vm353_vm0, %v2394_v6 }
 0x102   :  { %1025 = vmatprep.mubr.bf16.mxu1 %v2332_v0  ;;  %1138 = vmatprep.mubr.bf16.mxu0 %v2332_v0 }
 0x109   :  { %2156 = vmatmul.mubr.msk.bf16.gmra.mrb[100].mxu1 %vm353_vm0, %v2404_v16  ;;  %2164 = vmatmul.mubr.msk.bf16.gmra.mrb[100].mxu0 %vm353_vm0, %v2404_v16 }
 0x10a   :  { %1035 = vmatprep.mubr.bf16.mxu1 %v2332_v0  ;;  %1148 = vmatprep.mubr.bf16.mxu0 %v2332_v0 }
 0x111   :  { %2157 = vmatmul.mubr.msk.bf16.gmra.mrb[104].mxu1 %vm353_vm0, %v2414_v20  ;;  %2165 = vmatmul.mubr.msk.bf16.gmra.mrb[104].mxu0 %vm353_vm0, %v2414_v20  ;;  %v133_v20 = vsub.s32 7, %v2564_v38 }
 0x112   :  { %1045 = vmatprep.mubr.bf16.mxu1 %v2332_v0  ;;  %1158 = vmatprep.mubr.bf16.mxu0 %v2332_v0  ;;  %v3756_v0 = vsub.s32 3, %v2564_v38 }
 0x114   :  { %v412_v43 = vpop.f32.mrb[0].mxu0  ;;  %v452_v44 = vpop.f32.mrb[0].mxu1  ;;  %v2629_v18 = vrot.slane %v2567_v40, %v3756_v0 }
 0x115   :  { %v414_v45 = vpop.f32.mrb[1].mxu0  ;;  %v454_v46 = vpop.f32.mrb[1].mxu1  ;;  %v413_v61 = vadd.f32 %v412_v43, %v2590_v51  ;;  %v453_v62 = vadd.f32 %v452_v44, %v2590_v51 }
 0x116   :  { %v2582_v47 = vadd.f32 %v414_v45, %v2576_v41  ;;  %v2585_v48 = vadd.f32 %v454_v46, %v2576_v41  ;;  %v416_v49 = vpop.f32.mrb[2].mxu0  ;;  %v456_v50 = vpop.f32.mrb[2].mxu1 }
 0x117   :  { %v418_v52 = vpop.f32.mrb[3].mxu0  ;;  %v458_v53 = vpop.f32.mrb[3].mxu1  ;;  %v417_v25 = vadd.f32 %v416_v49, %v2590_v51  ;;  %v457_v26 = vadd.f32 %v456_v50, %v2590_v51  ;;  %v2660_v49 = vrot.slane %v2567_v40, %v129_v19  ;;  %v2663_v50 = vrot.slane %v2567_v40, %v133_v20 }
 0x118   :  { %v1172_v54 = vrot.slane %v2582_v47, 1  ;;  %v419_v55 = vadd.f32 %v418_v52, %v2576_v41  ;;  %v459_v56 = vadd.f32 %v458_v53, %v2576_v41  ;;  %v1180_v57 = vrot.slane %v2585_v48, 1 }
 0x119   :  { %2158 = vmatmul.mubr.msk.bf16.gmra.mrb[108].mxu1 %vm353_vm0, %v2424_v22  ;;  %2166 = vmatmul.mubr.msk.bf16.gmra.mrb[108].mxu0 %vm353_vm0, %v2424_v22  ;;  %v2677_v40 = vrot.slane %v2653_v37, %v109_v39 }
 0x11a   :  { %v1173_v58 = vrot.slane %v419_v55, 1  ;;  %v1181_v59 = vrot.slane %v459_v56, 1 }
 0x11c   :  { %v1203_v1 = vsel %vm1188_vm1, %v1172_v54, %v1173_v58  ;;  %v1195_v2 = vsel %vm1188_vm1, %v1180_v57, %v1181_v59  ;;  %v422_v3 = vpop.f32.mrb[4].mxu0  ;;  %v462_v4 = vpop.f32.mrb[4].mxu1 }
 0x11d   :  { %v1205_v5 = vadd.f32 %v1203_v1, %v413_v61  ;;  %v1213_v6 = vadd.f32 %v1195_v2, %v453_v62  ;;  %v424_v7 = vpop.f32.mrb[5].mxu0  ;;  %v464_v8 = vpop.f32.mrb[5].mxu1  ;;  %v423_v33 = vadd.f32 %v422_v3, %v2590_v51  ;;  %v463_v34 = vadd.f32 %v462_v4, %v2590_v51 }
 0x11e   :  { %v425_v11 = vadd.f32 %v424_v7, %v2576_v41  ;;  %v465_v12 = vadd.f32 %v464_v8, %v2576_v41  ;;  %v426_v13 = vpop.f32.mrb[6].mxu0  ;;  %v466_v14 = vpop.f32.mrb[6].mxu1  ;;  %v2672_v3 = vrot.slane %v2653_v37, %v105_v42 }
 0x11f   :  { %v428_v15 = vpop.f32.mrb[7].mxu0  ;;  %v468_v16 = vpop.f32.mrb[7].mxu1  ;;  %v427_v4 = vadd.f32 %v426_v13, %v2590_v51  ;;  %v467_v7 = vadd.f32 %v466_v14, %v2590_v51 }
 0x120   :  { %v1174_v21 = vrot.slane %v425_v11, 1  ;;  %v1182_v22 = vrot.slane %v465_v12, 1  ;;  %v429_v23 = vadd.f32 %v428_v15, %v2576_v41  ;;  %v469_v24 = vadd.f32 %v468_v16, %v2576_v41 }
 0x122   :  { %v1202_v29 = vsel %vm1188_vm1, %v1173_v58, %v1174_v21  ;;  %v1194_v30 = vsel %vm1188_vm1, %v1181_v59, %v1182_v22  ;;  %v1175_v31 = vrot.slane %v429_v23, 1  ;;  %v1183_v32 = vrot.slane %v469_v24, 1 }
 0x123   :  { %v1206_v35 = vadd.f32 %v1202_v29, %v417_v25  ;;  %v1214_v36 = vadd.f32 %v1194_v30, %v457_v26 }
 0x124   :  { %v1201_v43 = vsel %vm1188_vm1, %v1174_v21, %v1175_v31  ;;  %v1193_v44 = vsel %vm1188_vm1, %v1182_v22, %v1183_v32  ;;  %v432_v45 = vpop.f32.mrb[8].mxu0  ;;  %v472_v46 = vpop.f32.mrb[8].mxu1 }
 0x125   :  { %v1224_v52 = vsel %vm1222_vm2, %v1206_v35, -inf  ;;  %v1232_v53 = vsel %vm1222_vm2, %v1214_v36, -inf  ;;  %v1207_v55 = vadd.f32 %v1201_v43, %v423_v33  ;;  %v1215_v56 = vadd.f32 %v1193_v44, %v463_v34  ;;  %v434_v58 = vpop.f32.mrb[9].mxu0  ;;  %v474_v59 = vpop.f32.mrb[9].mxu1 }
 0x126   :  { %v1239_v61 = vmax.f32 %v1205_v5, %v1224_v52  ;;  %v1267_v62 = vmax.f32 %v1213_v6, %v1232_v53  ;;  %v436_v1 = vpop.f32.mrb[10].mxu0  ;;  %v476_v2 = vpop.f32.mrb[10].mxu1  ;;  %v435_v8 = vadd.f32 %v434_v58, %v2576_v41  ;;  %v475_v5 = vadd.f32 %v474_v59, %v2576_v41 }
 0x127   :  { %v438_v6 = vpop.f32.mrb[11].mxu0  ;;  %v478_v11 = vpop.f32.mrb[11].mxu1  ;;  %v433_v19 = vadd.f32 %v432_v45, %v2590_v51  ;;  %v473_v39 = vadd.f32 %v472_v46, %v2590_v51  ;;  %v437_v26 = vadd.f32 %v436_v1, %v2590_v51  ;;  %v477_v29 = vadd.f32 %v476_v2, %v2590_v51 }
 0x128   :  { %v1240_v12 = vrot.slane %v1239_v61, 4  ;;  %v1268_v15 = vrot.slane %v1267_v62, 4  ;;  %v439_v42 = vadd.f32 %v438_v6, %v2576_v41  ;;  %v479_v16 = vadd.f32 %v478_v11, %v2576_v41 }
 0x129   :  { %v1176_v20 = vrot.slane %v435_v8, 1  ;;  %v1184_v13 = vrot.slane %v475_v5, 1 }
 0x12a   :  { %v1241_v21 = vmax.f32 %v1239_v61, %v1240_v12  ;;  %v1269_v14 = vmax.f32 %v1267_v62, %v1268_v15  ;;  %v1177_v22 = vrot.slane %v439_v42, 1  ;;  %v1185_v23 = vrot.slane %v479_v16, 1 }
 0x12b   :  { %v1200_v24 = vsel %vm1188_vm1, %v1175_v31, %v1176_v20  ;;  %v1192_v25 = vsel %vm1188_vm1, %v1183_v32, %v1184_v13 }
 0x12c   :  { %v1242_v30 = vrot.slane %v1241_v21, 2  ;;  %v1270_v33 = vrot.slane %v1269_v14, 2  ;;  %v1208_v34 = vadd.f32 %v1200_v24, %v427_v4  ;;  %v1216_v35 = vadd.f32 %v1192_v25, %v467_v7  ;;  %v442_v36 = vpop.f32.mrb[12].mxu0  ;;  %v482_v43 = vpop.f32.mrb[12].mxu1 }
 0x12d   :  { %v1199_v44 = vsel %vm1188_vm1, %v1176_v20, %v1177_v22  ;;  %v1191_v45 = vsel %vm1188_vm1, %v1184_v13, %v1185_v23  ;;  %v2698_v31 = vadd.f32 %v442_v36, %v2590_v51  ;;  %v2701_v32 = vadd.f32 %v482_v43, %v2590_v51  ;;  %v444_v46 = vpop.f32.mrb[13].mxu0  ;;  %v484_v52 = vpop.f32.mrb[13].mxu1 }
 0x12e   :  { %v1243_v53 = vmax.f32 %v1241_v21, %v1242_v30  ;;  %v1271_v58 = vmax.f32 %v1269_v14, %v1270_v33  ;;  %v1226_v59 = vsel %vm1222_vm2, %v1208_v34, -inf  ;;  %v1234_v61 = vsel %vm1222_vm2, %v1216_v35, -inf  ;;  %v446_v62 = vpop.f32.mrb[14].mxu0  ;;  %v486_v1 = vpop.f32.mrb[14].mxu1 }
 0x12f   :  { %v1246_v2 = vmax.f32 %v1207_v55, %v1226_v59  ;;  %v1274_v4 = vmax.f32 %v1215_v56, %v1234_v61  ;;  %v1209_v7 = vadd.f32 %v1199_v44, %v433_v19  ;;  %v1217_v8 = vadd.f32 %v1191_v45, %v473_v39  ;;  %v448_v5 = vpop.f32.mrb[15].mxu0  ;;  %v488_v6 = vpop.f32.mrb[15].mxu1 }
 0x130   :  { %v1244_v11 = vrot.slane %v1243_v53, 1  ;;  %v1272_v12 = vrot.slane %v1271_v58, 1  ;;  %v445_v15 = vadd.f32 %v444_v46, %v2576_v41  ;;  %v485_v42 = vadd.f32 %v484_v52, %v2576_v41 }
 0x131   :  { %v1247_v16 = vrot.slane %v1246_v2, 4  ;;  %v1275_v20 = vrot.slane %v1274_v4, 4  ;;  %v447_v13 = vadd.f32 %v446_v62, %v2590_v51  ;;  %v487_v21 = vadd.f32 %v486_v1, %v2590_v51 }
 0x132   :  { %v2711_v14 = vmax.f32 %v1243_v53, %v1244_v11  ;;  %v2713_v55 = vmax.f32 %v1271_v58, %v1272_v12  ;;  %v1178_v56 = vrot.slane %v445_v15, 1  ;;  %v1186_v19 = vrot.slane %v485_v42, 1 }
 0x133   :  { %v1248_v39 = vmax.f32 %v1246_v2, %v1247_v16  ;;  %v1276_v24 = vmax.f32 %v1274_v4, %v1275_v20  ;;  %v449_v25 = vadd.f32 %v448_v5, %v2576_v41  ;;  %v489_v30 = vadd.f32 %v488_v6, %v2576_v41 }
 0x134   :  { %3785 = vst [vmem:[#allocation12_spill] sm:$0xff] %v2713_v55  ;;  %v1295_v33 = vmax.f32 %v2711_v14, 0.0  ;;  %v1198_v51 = vsel %vm1188_vm1, %v1177_v22, %v1178_v56  ;;  %v1190_v35 = vsel %vm1188_vm1, %v1185_v23, %v1186_v19  ;;  %v525_v36 = vpop.f32.mrb[16].mxu1  ;;  %v638_v43 = vpop.f32.mrb[16].mxu0 }
 0x135   :  { %v1249_v44 = vrot.slane %v1248_v39, 2  ;;  %v1277_v45 = vrot.slane %v1276_v24, 2  ;;  %v1210_v46 = vadd.f32 %v1198_v51, %v437_v26  ;;  %v1218_v52 = vadd.f32 %v1190_v35, %v477_v29  ;;  %v527_v53 = vpop.f32.mrb[17].mxu1  ;;  %v640_v58 = vpop.f32.mrb[17].mxu0 }
 0x136   :  { %v1179_v41 = vrot.slane %v449_v25, 1  ;;  %v1187_v59 = vrot.slane %v489_v30, 1  ;;  %v2724_v61 = vadd.f32 %v525_v36, %v2624_v17  ;;  %v2727_v62 = vadd.f32 %v527_v53, %v2629_v18  ;;  %v529_v22 = vpop.f32.mrb[18].mxu1  ;;  %v642_v1 = vpop.f32.mrb[18].mxu0 }
 0x137   :  { %v1250_v2 = vmax.f32 %v1248_v39, %v1249_v44  ;;  %v1278_v23 = vmax.f32 %v1276_v24, %v1277_v45  ;;  %v1228_v4 = vsel %vm1222_vm2, %v1210_v46, -inf  ;;  %v1236_v26 = vsel %vm1222_vm2, %v1218_v52, -inf  ;;  %v531_v29 = vpop.f32.mrb[19].mxu1  ;;  %v644_v5 = vpop.f32.mrb[19].mxu0 }
 0x138   :  { %v1253_v6 = vmax.f32 %v1209_v7, %v1228_v4  ;;  %v1281_v11 = vmax.f32 %v1217_v8, %v1236_v26  ;;  %v1196_v12 = vsel %vm1188_vm1, %v1179_v41, %v1180_v57  ;;  %v1197_v15 = vsel %vm1188_vm1, %v1178_v56, %v1179_v41 }
 0x139   :  { %v1251_v42 = vrot.slane %v1250_v2, 1  ;;  %v1279_v16 = vrot.slane %v1278_v23, 1  ;;  %v1211_v20 = vadd.f32 %v1197_v15, %v2698_v31  ;;  %v1212_v14 = vadd.f32 %v1196_v12, %v447_v13 }
 0x13a   :  { %v1254_v39 = vrot.slane %v1253_v6, 4  ;;  %v1282_v24 = vrot.slane %v1281_v11, 4  ;;  %v1189_v25 = vsel %vm1188_vm1, %v1186_v19, %v1187_v59  ;;  %v1204_v48 = vsel %vm1188_vm1, %v1187_v59, %v1172_v54 }
 0x13b   :  { %v1252_v57 = vmax.f32 %v1250_v2, %v1251_v42  ;;  %v2747_v7 = vmax.f32 %v1278_v23, %v1279_v16  ;;  %v1230_v8 = vsel %vm1222_vm2, %v1212_v14, -inf  ;;  %v1219_v31 = vadd.f32 %v1189_v25, %v2701_v32 }
 0x13c   :  { %v1255_v13 = vmax.f32 %v1253_v6, %v1254_v39  ;;  %v1283_v56 = vmax.f32 %v1281_v11, %v1282_v24  ;;  %v1260_v30 = vmax.f32 %v1211_v20, %v1230_v8  ;;  %v1220_v51 = vadd.f32 %v1204_v48, %v487_v21  ;;  %v535_v19 = vpop.f32.mrb[20].mxu1  ;;  %v648_v35 = vpop.f32.mrb[20].mxu0 }
 0x13d   :  { %3786 = vst [vmem:[#allocation13_spill] sm:$0xff] %v2747_v7  ;;  %v1296_v47 = vmax.f32 %v1252_v57, 0.0  ;;  %v3754_v54 = vrot.slane %v2727_v62, 1  ;;  %v2755_v44 = vadd.f32 %v529_v22, %v2624_v17  ;;  %v537_v45 = vpop.f32.mrb[21].mxu1  ;;  %v650_v46 = vpop.f32.mrb[21].mxu0  ;;  %v2761_v4 = vadd.f32 %v638_v43, %v2640_v27 }
 0x13e   :  { %v1256_v52 = vrot.slane %v1255_v13, 2  ;;  %v1284_v53 = vrot.slane %v1283_v56, 2  ;;  %v1261_v32 = vrot.slane %v1260_v30, 4  ;;  %v1238_v41 = vsel %vm1222_vm2, %v1220_v51, -inf  ;;  %v539_v21 = vpop.f32.mrb[22].mxu1  ;;  %v652_v59 = vpop.f32.mrb[22].mxu0 }
 0x13f   :  { %v1312_v2 = vsel %vm1311_vm3, %v1296_v47, %v1295_v33  ;;  %v1288_v23 = vmax.f32 %v1219_v31, %v1238_v41  ;;  %v532_v26 = vadd.f32 %v531_v29, %v2629_v18  ;;  %v541_v22 = vpop.f32.mrb[23].mxu1  ;;  %v654_v6 = vpop.f32.mrb[23].mxu0  ;;  %v2765_v42 = vadd.f32 %v640_v58, %v2645_v28 }
 0x140   :  { %v1257_v11 = vmax.f32 %v1255_v13, %v1256_v52  ;;  %v1285_v12 = vmax.f32 %v1283_v56, %v1284_v53  ;;  %v1262_v15 = vmax.f32 %v1260_v30, %v1261_v32  ;;  %v3755_v20 = vrot.slane %v2761_v4, 2 }
 0x141   :  { %v1289_v16 = vrot.slane %v1288_v23, 4  ;;  %v1328_v14 = vrot.slane %v532_v26, 1  ;;  %v643_v33 = vadd.f32 %v642_v1, %v2640_v27  ;;  %v2770_v25 = vadd.f32 %v644_v5, %v2645_v28 }
 0x142   :  { %v1258_v39 = vrot.slane %v1257_v11, 1  ;;  %v1286_v24 = vrot.slane %v1285_v12, 1  ;;  %v1263_v43 = vrot.slane %v1262_v15, 2  ;;  %v536_v57 = vadd.f32 %v535_v19, %v2624_v17 }
 0x143   :  { %v1290_v29 = vmax.f32 %v1288_v23, %v1289_v16  ;;  %v1357_v48 = vsel %vm1188_vm1, %v3754_v54, %v1328_v14  ;;  %v1376_v58 = vrot.slane %v643_v33, 2  ;;  %v649_v47 = vadd.f32 %v648_v35, %v2640_v27 }
 0x144   :  { %v1259_v8 = vmax.f32 %v1257_v11, %v1258_v39  ;;  %v2778_v31 = vmax.f32 %v1285_v12, %v1286_v24  ;;  %v1264_v1 = vmax.f32 %v1262_v15, %v1263_v43  ;;  %v1359_v13 = vadd.f32 %v1357_v48, %v2724_v61  ;;  %v545_v56 = vpop.f32.mrb[24].mxu1  ;;  %v658_v5 = vpop.f32.mrb[24].mxu0 }
 0x145   :  { %v1291_v30 = vrot.slane %v1290_v29, 2  ;;  %v1406_v51 = vsel %vm1391_vm4, %v3755_v20, %v1376_v58  ;;  %v538_v19 = vadd.f32 %v537_v45, %v2629_v18  ;;  %v547_v52 = vpop.f32.mrb[25].mxu1  ;;  %v660_v53 = vpop.f32.mrb[25].mxu0  ;;  %v1377_v15 = vrot.slane %v649_v47, 2 }
 0x146   :  { %3787 = vst [vmem:[#allocation14_spill] sm:$0xff] %v2778_v31  ;;  %v1297_v32 = vmax.f32 %v1259_v8, 0.0  ;;  %v1265_v23 = vrot.slane %v1264_v1, 1  ;;  %v1408_v26 = vadd.f32 %v1406_v51, %v1359_v13  ;;  %v549_v61 = vpop.f32.mrb[26].mxu1  ;;  %v662_v11 = vpop.f32.mrb[26].mxu0  ;;  %v540_v33 = vadd.f32 %v539_v21, %v2624_v17 }
 0x147   :  { %v2788_v12 = vmax.f32 %v1290_v29, %v1291_v30  ;;  %v1329_v16 = vrot.slane %v538_v19, 1  ;;  %v551_v39 = vpop.f32.mrb[27].mxu1  ;;  %v664_v24 = vpop.f32.mrb[27].mxu0  ;;  %v542_v43 = vadd.f32 %v541_v22, %v2629_v18  ;;  %v2798_v48 = vadd.f32 %v650_v46, %v2645_v28 }
 0x148   :  { %v2792_v35 = vsel %vm1313_vm5, %v1297_v32, %v1312_v2  ;;  %v2794_v45 = vmax.f32 %v1264_v1, %v1265_v23  ;;  %v1405_v29 = vsel %vm1391_vm4, %v1376_v58, %v1377_v15  ;;  %v653_v13 = vadd.f32 %v652_v59, %v2640_v27 }
 0x149   :  { %3788 = vst [vmem:[#allocation15_spill] sm:$0xff] %v2788_v12  ;;  %3789 = vst [vmem:[#allocation16_spill] sm:$0xff] %v2792_v35  ;;  %v1356_v21 = vsel %vm1188_vm1, %v1328_v14, %v1329_v16  ;;  %v1330_v30 = vrot.slane %v542_v43, 1  ;;  %v2809_v22 = vadd.f32 %v654_v6, %v2645_v28  ;;  %v546_v51 = vadd.f32 %v545_v56, %v2624_v17 }
 0x14a   :  { %3790 = vst [vmem:[#allocation17_spill] sm:$0xff] %v2794_v45  ;;  %v1360_v1 = vadd.f32 %v1356_v21, %v2755_v44  ;;  %v1378_v46 = vrot.slane %v653_v13, 2  ;;  %v659_v47 = vadd.f32 %v658_v5, %v2640_v27  ;;  %v548_v58 = vadd.f32 %v547_v52, %v2629_v18 }
 0x14b   :  { %v1355_v14 = vsel %vm1188_vm1, %v1329_v16, %v1330_v30  ;;  %v550_v59 = vadd.f32 %v549_v61, %v2624_v17  ;;  %v552_v32 = vadd.f32 %v551_v39, %v2629_v18  ;;  %v2823_v16 = vadd.f32 %v660_v53, %v2645_v28 }
 0x14c   :  { %v1409_v19 = vadd.f32 %v1405_v29, %v1360_v1  ;;  %v555_v44 = vpop.f32.mrb[28].mxu1  ;;  %v668_v23 = vpop.f32.mrb[28].mxu0  ;;  %v1361_v43 = vadd.f32 %v1355_v14, %v536_v57  ;;  %v1404_v6 = vsel %vm1391_vm4, %v1377_v15, %v1378_v46  ;;  %v1379_v21 = vrot.slane %v659_v47, 2 }
 0x14d   :  { %v1331_v56 = vrot.slane %v548_v58, 1  ;;  %v557_v13 = vpop.f32.mrb[29].mxu1  ;;  %v670_v5 = vpop.f32.mrb[29].mxu0  ;;  %v1332_v29 = vrot.slane %v552_v32, 1  ;;  %v663_v61 = vadd.f32 %v662_v11, %v2640_v27  ;;  %v2833_v32 = vadd.f32 %v664_v24, %v2645_v28 }
 0x14e   :  { %v1427_v52 = vsel %vm1425_vm6, %v1409_v19, -inf  ;;  %v559_v39 = vpop.f32.mrb[30].mxu1  ;;  %v672_v1 = vpop.f32.mrb[30].mxu0  ;;  %v1410_v57 = vadd.f32 %v1404_v6, %v1361_v43  ;;  %v1403_v15 = vsel %vm1391_vm4, %v1378_v46, %v1379_v21  ;;  %v669_v43 = vadd.f32 %v668_v23, %v2640_v27 }
 0x14f   :  { %v1442_v41 = vmax.f32 %v1408_v26, %v1427_v52  ;;  %v1354_v47 = vsel %vm1188_vm1, %v1330_v30, %v1331_v56  ;;  %v561_v58 = vpop.f32.mrb[31].mxu1  ;;  %v674_v14 = vpop.f32.mrb[31].mxu0  ;;  %v1353_v19 = vsel %vm1188_vm1, %v1331_v56, %v1332_v29  ;;  %v1380_v53 = vrot.slane %v663_v61, 2 }
 0x150   :  { %v1362_v36 = vadd.f32 %v1354_v47, %v540_v33  ;;  %v1363_v34 = vadd.f32 %v1353_v19, %v546_v51  ;;  %v556_v26 = vadd.f32 %v555_v44, %v2624_v17  ;;  %v558_v6 = vadd.f32 %v557_v13, %v2629_v18 }
 0x151   :  { %v1443_v11 = vrot.slane %v1442_v41, 4  ;;  %v1402_v30 = vsel %vm1391_vm4, %v1379_v21, %v1380_v53  ;;  %v560_v33 = vadd.f32 %v559_v39, %v2624_v17  ;;  %v1381_v61 = vrot.slane %v669_v43, 2 }
 0x152   :  { %v1411_v46 = vadd.f32 %v1403_v15, %v1362_v36  ;;  %v1412_v56 = vadd.f32 %v1402_v30, %v1363_v34  ;;  %v562_v24 = vadd.f32 %v561_v58, %v2629_v18  ;;  %v1333_v47 = vrot.slane %v558_v6, 1 }
 0x153   :  { %v1444_v52 = vmax.f32 %v1442_v41, %v1443_v11  ;;  %v2845_v44 = vadd.f32 %v670_v5, %v2645_v28  ;;  %v673_v36 = vadd.f32 %v672_v1, %v2640_v27  ;;  %v1401_v41 = vsel %vm1391_vm4, %v1380_v53, %v1381_v61 }
 0x154   :  { %v1429_v51 = vsel %vm1425_vm6, %v1411_v46, -inf  ;;  %v565_v23 = vpop.f32.mrb[32].mxu1  ;;  %v678_v21 = vpop.f32.mrb[32].mxu0  ;;  %v1334_v34 = vrot.slane %v562_v24, 1  ;;  %v1352_v58 = vsel %vm1188_vm1, %v1332_v29, %v1333_v47  ;;  %v2853_v43 = vadd.f32 %v674_v14, %v2645_v28 }
 0x155   :  { %v1445_v15 = vrot.slane %v1444_v52, 2  ;;  %v1449_v13 = vmax.f32 %v1410_v57, %v1429_v51  ;;  %v567_v39 = vpop.f32.mrb[33].mxu1  ;;  %v680_v19 = vpop.f32.mrb[33].mxu0  ;;  %v1382_v11 = vrot.slane %v673_v36, 2  ;;  %v566_v5 = vadd.f32 %v565_v23, %v2624_v17 }
 0x156   :  { %v569_v1 = vpop.f32.mrb[34].mxu1  ;;  %v682_v46 = vpop.f32.mrb[34].mxu0  ;;  %v1364_v57 = vadd.f32 %v1352_v58, %v550_v59  ;;  %v1351_v53 = vsel %vm1188_vm1, %v1333_v47, %v1334_v34  ;;  %v679_v36 = vadd.f32 %v678_v21, %v2640_v27  ;;  %v568_v14 = vadd.f32 %v567_v39, %v2629_v18 }
 0x157   :  { %v1446_v30 = vmax.f32 %v1444_v52, %v1445_v15  ;;  %v1450_v6 = vrot.slane %v1449_v13, 4  ;;  %v571_v24 = vpop.f32.mrb[35].mxu1  ;;  %v684_v51 = vpop.f32.mrb[35].mxu0  ;;  %v1365_v2 = vadd.f32 %v1351_v53, %v556_v26  ;;  %v1400_v29 = vsel %vm1391_vm4, %v1381_v61, %v1382_v11 }
 0x158   :  { %v1413_v10 = vadd.f32 %v1401_v41, %v1364_v57  ;;  %v2863_v52 = vadd.f32 %v569_v1, %v2624_v17  ;;  %v1383_v15 = vrot.slane %v679_v36, 2  ;;  %v1335_v58 = vrot.slane %v568_v14, 1 }
 0x159   :  { %v1447_v8 = vrot.slane %v1446_v30, 1  ;;  %v1451_v23 = vmax.f32 %v1449_v13, %v1450_v6  ;;  %v1414_v59 = vadd.f32 %v1400_v29, %v1365_v2  ;;  %v572_v47 = vadd.f32 %v571_v24, %v2629_v18 }
 0x15a   :  { %v1431_v61 = vsel %vm1425_vm6, %v1413_v10, -inf  ;;  %v2869_v21 = vadd.f32 %v680_v19, %v2645_v28  ;;  %v1399_v13 = vsel %vm1391_vm4, %v1382_v11, %v1383_v15  ;;  %v1350_v41 = vsel %vm1188_vm1, %v1334_v34, %v1335_v58 }
 0x15b   :  { %v1448_v9 = vmax.f32 %v1446_v30, %v1447_v8  ;;  %v1452_v26 = vrot.slane %v1451_v23, 2  ;;  %v1456_v39 = vmax.f32 %v1412_v56, %v1431_v61  ;;  %v1336_v2 = vrot.slane %v572_v47, 1 }
 0x15c   :  { %v575_v1 = vpop.f32.mrb[36].mxu1  ;;  %v688_v6 = vpop.f32.mrb[36].mxu0  ;;  %v1366_v8 = vadd.f32 %v1350_v41, %v560_v33  ;;  %v683_v30 = vadd.f32 %v682_v46, %v2640_v27  ;;  %v2879_v19 = vadd.f32 %v684_v51, %v2645_v28 }
 0x15d   :  { %v1498_v57 = vmax.f32 %v1448_v9, 0.0  ;;  %v1453_v53 = vmax.f32 %v1451_v23, %v1452_v26  ;;  %v577_v24 = vpop.f32.mrb[37].mxu1  ;;  %v690_v10 = vpop.f32.mrb[37].mxu0  ;;  %v1457_v29 = vrot.slane %v1456_v39, 4  ;;  %v1349_v56 = vsel %vm1188_vm1, %v1335_v58, %v1336_v2 }
 0x15e   :  { %v576_v11 = vadd.f32 %v575_v1, %v2624_v17  ;;  %v579_v34 = vpop.f32.mrb[38].mxu1  ;;  %v692_v36 = vpop.f32.mrb[38].mxu0  ;;  %v1415_v47 = vadd.f32 %v1399_v13, %v1366_v8  ;;  %v1367_v9 = vadd.f32 %v1349_v56, %v566_v5  ;;  %v1384_v23 = vrot.slane %v683_v30, 2 }
 0x15f   :  { %v1454_v14 = vrot.slane %v1453_v53, 1  ;;  %v581_v33 = vpop.f32.mrb[39].mxu1  ;;  %v694_v26 = vpop.f32.mrb[39].mxu0  ;;  %v1458_v46 = vmax.f32 %v1456_v39, %v1457_v29  ;;  %v689_v61 = vadd.f32 %v688_v6, %v2640_v27  ;;  %v578_v41 = vadd.f32 %v577_v24, %v2629_v18 }
 0x160   :  { %v580_v58 = vadd.f32 %v579_v34, %v2624_v17  ;;  %v1433_v51 = vsel %vm1425_vm6, %v1415_v47, -inf  ;;  %v1398_v1 = vsel %vm1391_vm4, %v1383_v15, %v1384_v23  ;;  %v582_v13 = vadd.f32 %v581_v33, %v2629_v18 }
 0x161   :  { %v1455_v54 = vmax.f32 %v1453_v53, %v1454_v14  ;;  %v1459_v5 = vrot.slane %v1458_v46, 2  ;;  %v1463_v8 = vmax.f32 %v1414_v59, %v1433_v51  ;;  %v1416_v30 = vadd.f32 %v1398_v1, %v1367_v9 }
 0x162   :  { %v1385_v56 = vrot.slane %v689_v61, 2  ;;  %v1337_v29 = vrot.slane %v578_v41, 1  ;;  %v1338_v6 = vrot.slane %v582_v13, 1  ;;  %v2891_v24 = vadd.f32 %v690_v10, %v2645_v28 }
 0x163   :  { %v1499_v39 = vmax.f32 %v1455_v54, 0.0  ;;  %v1460_v34 = vmax.f32 %v1458_v46, %v1459_v5  ;;  %v1464_v53 = vrot.slane %v1463_v8, 4  ;;  %v693_v47 = vadd.f32 %v692_v36, %v2640_v27 }
 0x164   :  { %v1397_v14 = vsel %vm1391_vm4, %v1384_v23, %v1385_v56  ;;  %v585_v15 = vpop.f32.mrb[40].mxu1  ;;  %v698_v20 = vpop.f32.mrb[40].mxu0  ;;  %v1348_v54 = vsel %vm1188_vm1, %v1336_v2, %v1337_v29  ;;  %v1347_v59 = vsel %vm1188_vm1, %v1337_v29, %v1338_v6  ;;  %v2904_v10 = vadd.f32 %v694_v26, %v2645_v28 }
 0x165   :  { %v2897_v33 = vsel %vm1311_vm3, %v1499_v39, %v1498_v57  ;;  %v587_v9 = vpop.f32.mrb[41].mxu1  ;;  %v700_v46 = vpop.f32.mrb[41].mxu0  ;;  %v1461_v61 = vrot.slane %v1460_v34, 1  ;;  %v1465_v23 = vmax.f32 %v1463_v8, %v1464_v53  ;;  %v1368_v36 = vadd.f32 %v1348_v54, %v2863_v52 }
 0x166   :  { %3791 = vst [vmem:[#allocation18_spill] sm:$0xff] %v2897_v33  ;;  %v1369_v41 = vadd.f32 %v1347_v59, %v576_v11  ;;  %v589_v51 = vpop.f32.mrb[42].mxu1  ;;  %v702_v1 = vpop.f32.mrb[42].mxu0  ;;  %v1386_v57 = vrot.slane %v693_v47, 2  ;;  %v586_v13 = vadd.f32 %v585_v15, %v2624_v17  ;;  %v699_v2 = vadd.f32 %v698_v20, %v2640_v27 }
 0x167   :  { %v588_v5 = vadd.f32 %v587_v9, %v2629_v18  ;;  %v591_v39 = vpop.f32.mrb[43].mxu1  ;;  %v704_v29 = vpop.f32.mrb[43].mxu0  ;;  %v2910_v26 = vmax.f32 %v1460_v34, %v1461_v61  ;;  %v1466_v0 = vrot.slane %v1465_v23, 2  ;;  %v1417_v63 = vadd.f32 %v1397_v14, %v1368_v36 }
 0x168   :  { %v590_v8 = vadd.f32 %v589_v51, %v2624_v17  ;;  %v1396_v52 = vsel %vm1391_vm4, %v1385_v56, %v1386_v57  ;;  %v1387_v11 = vrot.slane %v699_v2, 2  ;;  %v592_v47 = vadd.f32 %v591_v39, %v2629_v18 }
 0x169   :  { %3792 = vst [vmem:[#allocation19_spill] sm:$0xff] %v2910_v26  ;;  %v1339_v53 = vrot.slane %v588_v5, 1  ;;  %v1467_v20 = vmax.f32 %v1465_v23, %v1466_v0  ;;  %v1435_v54 = vsel %vm1425_vm6, %v1417_v63, -inf  ;;  %v1418_v59 = vadd.f32 %v1396_v52, %v1369_v41 }
 0x16a   :  { %v1470_v34 = vmax.f32 %v1416_v30, %v1435_v54  ;;  %v1395_v14 = vsel %vm1391_vm4, %v1386_v57, %v1387_v11  ;;  %v1340_v61 = vrot.slane %v592_v47, 1  ;;  %v2924_v51 = vadd.f32 %v700_v46, %v2645_v28 }
 0x16b   :  { %v1346_v9 = vsel %vm1188_vm1, %v1338_v6, %v1339_v53  ;;  %v1468_v56 = vrot.slane %v1467_v20, 1  ;;  %v703_v2 = vadd.f32 %v702_v1, %v2640_v27  ;;  %v2930_v30 = vadd.f32 %v704_v29, %v2645_v28 }
 0x16c   :  { %v1370_v36 = vadd.f32 %v1346_v9, %v580_v58  ;;  %v595_v0 = vpop.f32.mrb[44].mxu1  ;;  %v708_v23 = vpop.f32.mrb[44].mxu0  ;;  %v1471_v5 = vrot.slane %v1470_v34, 4  ;;  %v1345_v63 = vsel %vm1188_vm1, %v1339_v53, %v1340_v61 }
 0x16d   :  { %v596_v41 = vadd.f32 %v595_v0, %v2624_v17  ;;  %v597_v6 = vpop.f32.mrb[45].mxu1  ;;  %v710_v57 = vpop.f32.mrb[45].mxu0  ;;  %v2933_v39 = vmax.f32 %v1467_v20, %v1468_v56  ;;  %v1371_v46 = vadd.f32 %v1345_v63, %v586_v13  ;;  %v1388_v52 = vrot.slane %v703_v2, 2 }
 0x16e   :  { %v1419_v58 = vadd.f32 %v1395_v14, %v1370_v36  ;;  %v599_v47 = vpop.f32.mrb[46].mxu1  ;;  %v712_v1 = vpop.f32.mrb[46].mxu0  ;;  %v1472_v54 = vmax.f32 %v1470_v34, %v1471_v5  ;;  %v709_v9 = vadd.f32 %v708_v23, %v2640_v27  ;;  %v598_v15 = vadd.f32 %v597_v6, %v2629_v18 }
 0x16f   :  { %3793 = vst [vmem:[#allocation20_spill] sm:$0xff] %v2933_v39  ;;  %v2938_v53 = vadd.f32 %v710_v57, %v2645_v28  ;;  %v601_v29 = vpop.f32.mrb[47].mxu1  ;;  %v714_v26 = vpop.f32.mrb[47].mxu0  ;;  %v1394_v13 = vsel %vm1391_vm4, %v1387_v11, %v1388_v52  ;;  %v600_v14 = vadd.f32 %v599_v47, %v2624_v17  ;;  %v713_v5 = vadd.f32 %v712_v1, %v2640_v27 }
 0x170   :  { %v1437_v20 = vsel %vm1425_vm6, %v1419_v58, -inf  ;;  %v1473_v34 = vrot.slane %v1472_v54, 2  ;;  %v1420_v36 = vadd.f32 %v1394_v13, %v1371_v46  ;;  %v1389_v2 = vrot.slane %v709_v9, 2 }
 0x171   :  { %v1477_v56 = vmax.f32 %v1418_v59, %v1437_v20  ;;  %v1341_v23 = vrot.slane %v598_v15, 1  ;;  %v602_v63 = vadd.f32 %v601_v29, %v2629_v18  ;;  %v2949_v6 = vadd.f32 %v714_v26, %v2645_v28 }
 0x172   :  { %v1474_v57 = vmax.f32 %v1472_v54, %v1473_v34  ;;  %v1393_v58 = vsel %vm1391_vm4, %v1388_v52, %v1389_v2  ;;  %v3794_v11 = vsub.s32 2, %v2564_v38  ;;  %v1390_v59 = vrot.slane %v713_v5, 2 }
 0x173   :  { %v1478_v0 = vrot.slane %v1477_v56, 4  ;;  %v1344_v15 = vsel %vm1188_vm1, %v1340_v61, %v1341_v23  ;;  %v1342_v27 = vrot.slane %v602_v63, 1  ;;  %v3795_v28 = vsub.s32 3, %v2564_v38 }
 0x174   :  { %v2956_v17 = vrot.slane %v2653_v37, %v3794_v11  ;;  %v751_v46 = vpop.f32.mrb[48].mxu1  ;;  %v864_v18 = vpop.f32.mrb[48].mxu0  ;;  %v1475_v47 = vrot.slane %v1474_v57, 1  ;;  %v1372_v52 = vadd.f32 %v1344_v15, %v590_v8  ;;  %v1392_v61 = vsel %vm1391_vm4, %v1389_v2, %v1390_v59 }
 0x175   :  { %v2963_v26 = vrot.slane %v2653_v37, %v3795_v28  ;;  %v1479_v1 = vmax.f32 %v1477_v56, %v1478_v0  ;;  %v2966_v54 = vadd.f32 %v751_v46, %v2660_v49  ;;  %v753_v9 = vpop.f32.mrb[49].mxu1  ;;  %v866_v29 = vpop.f32.mrb[49].mxu0  ;;  %v3796_v20 = vrot.slane %v2761_v4, 2 }
 0x176   :  { %v1343_v37 = vsel %vm1188_vm1, %v1341_v23, %v1342_v27  ;;  %v3797_v8 = vrot.slane %v2727_v62, 1  ;;  %v755_v34 = vpop.f32.mrb[50].mxu1  ;;  %v868_v56 = vpop.f32.mrb[50].mxu0  ;;  %v2981_v5 = vmax.f32 %v1474_v57, %v1475_v47  ;;  %v1421_v11 = vadd.f32 %v1393_v58, %v1372_v52 }
 0x177   :  { %v1407_v13 = vsel %vm1391_vm4, %v1390_v59, %v3796_v20  ;;  %v1480_v63 = vrot.slane %v1479_v1, 2  ;;  %v1373_v2 = vadd.f32 %v1343_v37, %v596_v41  ;;  %v757_v15 = vpop.f32.mrb[51].mxu1  ;;  %v870_v4 = vpop.f32.mrb[51].mxu0  ;;  %v3759_v59 = vrot.slane %v2966_v54, 1 }
 0x178   :  { %v1358_v0 = vsel %vm1188_vm1, %v1342_v27, %v3797_v8  ;;  %3798 = vst [vmem:[#allocation21_spill] sm:$0xff] %v2981_v5  ;;  %v2985_v28 = vadd.f32 %v753_v9, %v2663_v50  ;;  %v756_v62 = vadd.f32 %v755_v34, %v2660_v49  ;;  %v1439_v57 = vsel %vm1425_vm6, %v1421_v11, -inf }
 0x179   :  { %v1374_v46 = vadd.f32 %v1358_v0, %v600_v14  ;;  %v1481_v27 = vmax.f32 %v1479_v1, %v1480_v63  ;;  %v1422_v47 = vadd.f32 %v1392_v61, %v1373_v2  ;;  %v1484_v20 = vmax.f32 %v1420_v36, %v1439_v57 }
 0x17a   :  { %v1524_v52 = vrot.slane %v756_v62, 1  ;;  %v2993_v37 = vadd.f32 %v864_v18, %v2672_v3  ;;  %v758_v9 = vadd.f32 %v757_v15, %v2663_v50  ;;  %v2997_v8 = vadd.f32 %v866_v29, %v2677_v40 }
 0x17b   :  { %v1423_v58 = vadd.f32 %v1407_v13, %v1374_v46  ;;  %v1482_v14 = vrot.slane %v1481_v27, 1  ;;  %v1485_v0 = vrot.slane %v1484_v20, 4  ;;  %v869_v61 = vadd.f32 %v868_v56, %v2672_v3 }
 0x17c   :  { %v1553_v36 = vsel %vm1188_vm1, %v3759_v59, %v1524_v52  ;;  %v761_v13 = vpop.f32.mrb[52].mxu1  ;;  %v874_v34 = vpop.f32.mrb[52].mxu0  ;;  %v3764_v29 = vrot.slane %v2993_v37, 3  ;;  %v1572_v62 = vrot.slane %v758_v9, 2 }
 0x17d   :  { %v1441_v1 = vsel %vm1425_vm6, %v1423_v58, -inf  ;;  %v3006_v18 = vmax.f32 %v1481_v27, %v1482_v14  ;;  %v1555_v11 = vadd.f32 %v1553_v36, %v2765_v42  ;;  %v763_v2 = vpop.f32.mrb[53].mxu1  ;;  %v876_v15 = vpop.f32.mrb[53].mxu0  ;;  %v1486_v46 = vmax.f32 %v1484_v20, %v1485_v0 }
 0x17e   :  { %v1491_v63 = vmax.f32 %v1422_v47, %v1441_v1  ;;  %v1620_v57 = vrot.slane %v869_v61, 3  ;;  %v3011_v58 = vadd.f32 %v870_v4, %v2677_v40  ;;  %v765_v23 = vpop.f32.mrb[54].mxu1  ;;  %v878_v59 = vpop.f32.mrb[54].mxu0  ;;  %v762_v27 = vadd.f32 %v761_v13, %v2660_v49 }
 0x17f   :  { %3799 = vst [vmem:[#allocation22_spill] sm:$0xff] %v3006_v18  ;;  %v875_v47 = vadd.f32 %v874_v34, %v2672_v3  ;;  %v767_v42 = vpop.f32.mrb[55].mxu1  ;;  %v880_v14 = vpop.f32.mrb[55].mxu0  ;;  %v1487_v1 = vrot.slane %v1486_v46, 2  ;;  %v3800_v20 = vrot.slane %v2985_v28, 2  ;;  %v764_v0 = vadd.f32 %v763_v2, %v2663_v50 }
 0x180   :  { %v1492_v41 = vrot.slane %v1491_v63, 4  ;;  %v1650_v9 = vsel %vm1635_vm7, %v3764_v29, %v1620_v57  ;;  %v1525_v13 = vrot.slane %v762_v27, 1  ;;  %v766_v5 = vadd.f32 %v765_v23, %v2660_v49 }
 0x181   :  { %v1601_v4 = vsel %vm1391_vm4, %v3800_v20, %v1572_v62  ;;  %v1621_v34 = vrot.slane %v875_v47, 3  ;;  %v3026_v56 = vmax.f32 %v1486_v46, %v1487_v1  ;;  %v1573_v18 = vrot.slane %v764_v0, 2 }
 0x182   :  { %v1493_v36 = vmax.f32 %v1491_v63, %v1492_v41  ;;  %v1603_v61 = vadd.f32 %v1601_v4, %v1555_v11  ;;  %v768_v39 = vadd.f32 %v767_v42, %v2663_v50  ;;  %v1552_v31 = vsel %vm1188_vm1, %v1524_v52, %v1525_v13 }
 0x183   :  { %3801 = vst [vmem:[#allocation23_spill] sm:$0xff] %v3026_v56  ;;  %v1649_v29 = vsel %vm1635_vm7, %v1620_v57, %v1621_v34  ;;  %v1556_v63 = vadd.f32 %v1552_v31, %v2770_v25  ;;  %v1600_v11 = vsel %vm1391_vm4, %v1572_v62, %v1573_v18  ;;  %v1526_v2 = vrot.slane %v766_v5, 1 }
 0x184   :  { %v1494_v33 = vrot.slane %v1493_v36, 2  ;;  %v1652_v20 = vadd.f32 %v1650_v9, %v1603_v61  ;;  %v771_v46 = vpop.f32.mrb[56].mxu1  ;;  %v884_v23 = vpop.f32.mrb[56].mxu0  ;;  %v1574_v47 = vrot.slane %v768_v39, 2  ;;  %v3041_v42 = vadd.f32 %v876_v15, %v2677_v40 }
 0x185   :  { %v879_v52 = vadd.f32 %v878_v59, %v2672_v3  ;;  %v773_v1 = vpop.f32.mrb[57].mxu1  ;;  %v886_v57 = vpop.f32.mrb[57].mxu0  ;;  %v1604_v4 = vadd.f32 %v1600_v11, %v1556_v63  ;;  %v1551_v25 = vsel %vm1188_vm1, %v1525_v13, %v1526_v2  ;;  %v3047_v31 = vadd.f32 %v880_v14, %v2677_v40 }
 0x186   :  { %v3038_v27 = vmax.f32 %v1493_v36, %v1494_v33  ;;  %v772_v5 = vadd.f32 %v771_v46, %v2660_v49  ;;  %v775_v62 = vpop.f32.mrb[58].mxu1  ;;  %v888_v33 = vpop.f32.mrb[58].mxu0  ;;  %v1557_v39 = vadd.f32 %v1551_v25, %v2798_v48  ;;  %v1599_v15 = vsel %vm1391_vm4, %v1573_v18, %v1574_v47 }
 0x187   :  { %v1622_v9 = vrot.slane %v879_v52, 3  ;;  %v885_v59 = vadd.f32 %v884_v23, %v2672_v3  ;;  %v777_v0 = vpop.f32.mrb[59].mxu1  ;;  %v890_v36 = vpop.f32.mrb[59].mxu0  ;;  %v1653_v61 = vadd.f32 %v1649_v29, %v1604_v4  ;;  %v774_v13 = vadd.f32 %v773_v1, %v2663_v50 }
 0x188   :  { %3802 = vst [vmem:[#allocation24_spill] sm:$0xff] %v3038_v27  ;;  %v1527_v63 = vrot.slane %v772_v5, 1  ;;  %v776_v14 = vadd.f32 %v775_v62, %v2660_v49  ;;  %v1605_v11 = vadd.f32 %v1599_v15, %v1557_v39  ;;  %v778_v48 = vadd.f32 %v777_v0, %v2663_v50 }
 0x189   :  { %v1648_v46 = vsel %vm1635_vm7, %v1621_v34, %v1622_v9  ;;  %v1623_v41 = vrot.slane %v885_v59, 3  ;;  %v1671_v18 = vsel %vm1669_vm8, %v1653_v61, -inf  ;;  %v1575_v52 = vrot.slane %v774_v13, 2 }
 0x18a   :  { %v1550_v23 = vsel %vm1188_vm1, %v1526_v2, %v1527_v63  ;;  %v1528_v29 = vrot.slane %v776_v14, 1  ;;  %v1686_v4 = vmax.f32 %v1652_v20, %v1671_v18  ;;  %v1654_v25 = vadd.f32 %v1648_v46, %v1605_v11 }
 0x18b   :  { %v1558_v1 = vadd.f32 %v1550_v23, %v2809_v22  ;;  %v1647_v5 = vsel %vm1635_vm7, %v1622_v9, %v1623_v41  ;;  %v1598_v34 = vsel %vm1391_vm4, %v1574_v47, %v1575_v52  ;;  %v1576_v39 = vrot.slane %v778_v48, 2 }
 0x18c   :  { %v1549_v62 = vsel %vm1188_vm1, %v1527_v63, %v1528_v29  ;;  %v3071_v15 = vadd.f32 %v886_v57, %v2677_v40  ;;  %v781_v2 = vpop.f32.mrb[60].mxu1  ;;  %v894_v59 = vpop.f32.mrb[60].mxu0  ;;  %v1687_v0 = vrot.slane %v1686_v4, 4  ;;  %v889_v22 = vadd.f32 %v888_v33, %v2672_v3 }
 0x18d   :  { %v1606_v20 = vadd.f32 %v1598_v34, %v1558_v1  ;;  %v1559_v61 = vadd.f32 %v1549_v62, %v2823_v16  ;;  %v783_v13 = vpop.f32.mrb[61].mxu1  ;;  %v896_v9 = vpop.f32.mrb[61].mxu0  ;;  %v1597_v47 = vsel %vm1391_vm4, %v1575_v52, %v1576_v39  ;;  %v3078_v14 = vadd.f32 %v890_v36, %v2677_v40 }
 0x18e   :  { %v782_v63 = vadd.f32 %v781_v2, %v2660_v49  ;;  %v895_v57 = vadd.f32 %v894_v59, %v2672_v3  ;;  %v785_v11 = vpop.f32.mrb[62].mxu1  ;;  %v898_v46 = vpop.f32.mrb[62].mxu0  ;;  %v1688_v48 = vmax.f32 %v1686_v4, %v1687_v0  ;;  %v1624_v16 = vrot.slane %v889_v22, 3 }
 0x18f   :  { %v1655_v18 = vadd.f32 %v1647_v5, %v1606_v20  ;;  %v1607_v23 = vadd.f32 %v1597_v47, %v1559_v61  ;;  %v787_v1 = vpop.f32.mrb[63].mxu1  ;;  %v900_v33 = vpop.f32.mrb[63].mxu0  ;;  %v784_v27 = vadd.f32 %v783_v13, %v2663_v50  ;;  %v786_v52 = vadd.f32 %v785_v11, %v2660_v49 }
 0x190   :  { %v1529_v34 = vrot.slane %v782_v63, 1  ;;  %v1625_v62 = vrot.slane %v895_v57, 3  ;;  %v1689_v36 = vrot.slane %v1688_v48, 2  ;;  %v1646_v59 = vsel %vm1635_vm7, %v1623_v41, %v1624_v16 }
 0x191   :  { %v1673_v2 = vsel %vm1669_vm8, %v1655_v18, -inf  ;;  %v788_v4 = vadd.f32 %v787_v1, %v2663_v50  ;;  %v1656_v0 = vadd.f32 %v1646_v59, %v1607_v23  ;;  %v1577_v47 = vrot.slane %v784_v27, 2 }
 0x192   :  { %v1693_v5 = vmax.f32 %v1654_v25, %v1673_v2  ;;  %v1548_v20 = vsel %vm1188_vm1, %v1528_v29, %v1529_v34  ;;  %v1645_v61 = vsel %vm1635_vm7, %v1624_v16, %v1625_v62  ;;  %v1690_v22 = vmax.f32 %v1688_v48, %v1689_v36 }
 0x193   :  { %v1560_v13 = vadd.f32 %v1548_v20, %v2833_v32  ;;  %v1530_v63 = vrot.slane %v786_v52, 1  ;;  %v1578_v11 = vrot.slane %v788_v4, 2  ;;  %v3095_v18 = vadd.f32 %v896_v9, %v2677_v40 }
 0x194   :  { %v1694_v57 = vrot.slane %v1693_v5, 4  ;;  %v899_v41 = vadd.f32 %v898_v46, %v2672_v3  ;;  %v791_v25 = vpop.f32.mrb[64].mxu1  ;;  %v904_v23 = vpop.f32.mrb[64].mxu0  ;;  %v1691_v1 = vrot.slane %v1690_v22, 1  ;;  %v1596_v29 = vsel %vm1391_vm4, %v1576_v39, %v1577_v47 }
 0x195   :  { %v1547_v48 = vsel %vm1188_vm1, %v1529_v34, %v1530_v63  ;;  %v3103_v32 = vadd.f32 %v900_v33, %v2677_v40  ;;  %v793_v27 = vpop.f32.mrb[65].mxu1  ;;  %v906_v16 = vpop.f32.mrb[65].mxu0  ;;  %v1608_v36 = vadd.f32 %v1596_v29, %v1560_v13  ;;  %v1595_v46 = vsel %vm1391_vm4, %v1577_v47, %v1578_v11 }
 0x196   :  { %v1695_v52 = vmax.f32 %v1693_v5, %v1694_v57  ;;  %v1561_v9 = vadd.f32 %v1547_v48, %v2845_v44  ;;  %v795_v2 = vpop.f32.mrb[66].mxu1  ;;  %v908_v59 = vpop.f32.mrb[66].mxu0  ;;  %v1692_v4 = vmax.f32 %v1690_v22, %v1691_v1  ;;  %v1626_v20 = vrot.slane %v899_v41, 3 }
 0x197   :  { %v792_v39 = vadd.f32 %v791_v25, %v2660_v49  ;;  %v905_v34 = vadd.f32 %v904_v23, %v2672_v3  ;;  %v797_v56 = vpop.f32.mrb[67].mxu1  ;;  %v910_v33 = vpop.f32.mrb[67].mxu0  ;;  %v1657_v55 = vadd.f32 %v1645_v61, %v1608_v36  ;;  %v794_v5 = vadd.f32 %v793_v27, %v2663_v50 }
 0x198   :  { %v1696_v7 = vrot.slane %v1695_v52, 2  ;;  %v1609_v45 = vadd.f32 %v1595_v46, %v1561_v9  ;;  %v1742_v13 = vmax.f32 %v1692_v4, 0.0  ;;  %v1644_v44 = vsel %vm1635_vm7, %v1625_v62, %v1626_v20 }
 0x199   :  { %v1531_v47 = vrot.slane %v792_v39, 1  ;;  %v1627_v57 = vrot.slane %v905_v34, 3  ;;  %v1675_v22 = vsel %vm1669_vm8, %v1657_v55, -inf  ;;  %v1579_v25 = vrot.slane %v794_v5, 2 }
 0x19a   :  { %v1697_v29 = vmax.f32 %v1695_v52, %v1696_v7  ;;  %v1658_v41 = vadd.f32 %v1644_v44, %v1609_v45  ;;  %v1700_v23 = vmax.f32 %v1656_v0, %v1675_v22  ;;  %v796_v48 = vadd.f32 %v795_v2, %v2660_v49 }
 0x19b   :  { %v1546_v1 = vsel %vm1188_vm1, %v1530_v63, %v1531_v47  ;;  %v1643_v61 = vsel %vm1635_vm7, %v1626_v20, %v1627_v57  ;;  %v1594_v7 = vsel %vm1391_vm4, %v1578_v11, %v1579_v25  ;;  %v798_v52 = vadd.f32 %v797_v56, %v2663_v50 }
 0x19c   :  { %v1698_v27 = vrot.slane %v1697_v29, 1  ;;  %v1562_v62 = vadd.f32 %v1546_v1, %v2853_v43  ;;  %v801_v55 = vpop.f32.mrb[68].mxu1  ;;  %v914_v45 = vpop.f32.mrb[68].mxu0  ;;  %v1701_v36 = vrot.slane %v1700_v23, 4  ;;  %v1532_v0 = vrot.slane %v796_v48, 1 }
 0x19d   :  { %v3125_v9 = vadd.f32 %v906_v16, %v2677_v40  ;;  %v909_v63 = vadd.f32 %v908_v59, %v2672_v3  ;;  %v803_v46 = vpop.f32.mrb[69].mxu1  ;;  %v916_v4 = vpop.f32.mrb[69].mxu0  ;;  %v1580_v39 = vrot.slane %v798_v52, 2  ;;  %v3129_v43 = vadd.f32 %v910_v33, %v2677_v40 }
 0x19e   :  { %v1699_v2 = vmax.f32 %v1697_v29, %v1698_v27  ;;  %v1610_v20 = vadd.f32 %v1594_v7, %v1562_v62  ;;  %v805_v11 = vpop.f32.mrb[70].mxu1  ;;  %v918_v34 = vpop.f32.mrb[70].mxu0  ;;  %v1702_v56 = vmax.f32 %v1700_v23, %v1701_v36  ;;  %v1545_v5 = vsel %vm1188_vm1, %v1531_v47, %v1532_v0 }
 0x19f   :  { %v1628_v44 = vrot.slane %v909_v63, 3  ;;  %v802_v16 = vadd.f32 %v801_v55, %v2660_v49  ;;  %v807_v22 = vpop.f32.mrb[71].mxu1  ;;  %v920_v1 = vpop.f32.mrb[71].mxu0  ;;  %v1563_v29 = vadd.f32 %v1545_v5, %v2869_v21  ;;  %v1593_v27 = vsel %vm1391_vm4, %v1579_v25, %v1580_v39 }
 0x1a0   :  { %v1743_v59 = vmax.f32 %v1699_v2, 0.0  ;;  %v1659_v48 = vadd.f32 %v1643_v61, %v1610_v20  ;;  %v1703_v33 = vrot.slane %v1702_v56, 2  ;;  %v915_v7 = vadd.f32 %v914_v45, %v2672_v3 }
 0x1a1   :  { %v1642_v62 = vsel %vm1635_vm7, %v1627_v57, %v1628_v44  ;;  %v1533_v23 = vrot.slane %v802_v16, 1  ;;  %v1611_v55 = vadd.f32 %v1593_v27, %v1563_v29  ;;  %v804_v61 = vadd.f32 %v803_v46, %v2663_v50 }
 0x1a2   :  { %v3141_v47 = vsel %vm1311_vm3, %v1743_v59, %v1742_v13  ;;  %v1677_v52 = vsel %vm1669_vm8, %v1659_v48, -inf  ;;  %v1704_v21 = vmax.f32 %v1702_v56, %v1703_v33  ;;  %v1629_v63 = vrot.slane %v915_v7, 3 }
 0x1a3   :  { %3803 = vst [vmem:[#allocation25_spill] sm:$0xff] %v3141_v47  ;;  %v1707_v36 = vmax.f32 %v1658_v41, %v1677_v52  ;;  %v1544_v25 = vsel %vm1188_vm1, %v1532_v0, %v1533_v23  ;;  %v1660_v2 = vadd.f32 %v1642_v62, %v1611_v55  ;;  %v1581_v20 = vrot.slane %v804_v61, 2 }
 0x1a4   :  { %v1564_v57 = vadd.f32 %v1544_v25, %v2879_v19  ;;  %v806_v45 = vadd.f32 %v805_v11, %v2660_v49  ;;  %v811_v13 = vpop.f32.mrb[72].mxu1  ;;  %v924_v5 = vpop.f32.mrb[72].mxu0  ;;  %v1705_v16 = vrot.slane %v1704_v21, 1  ;;  %v1641_v48 = vsel %vm1635_vm7, %v1628_v44, %v1629_v63 }
 0x1a5   :  { %v1708_v59 = vrot.slane %v1707_v36, 4  ;;  %v808_v46 = vadd.f32 %v807_v22, %v2663_v50  ;;  %v813_v41 = vpop.f32.mrb[73].mxu1  ;;  %v926_v56 = vpop.f32.mrb[73].mxu0  ;;  %v1592_v0 = vsel %vm1391_vm4, %v1580_v39, %v1581_v20  ;;  %v3156_v19 = vadd.f32 %v916_v4, %v2677_v40 }
 0x1a6   :  { %v1534_v29 = vrot.slane %v806_v45, 1  ;;  %v919_v11 = vadd.f32 %v918_v34, %v2672_v3  ;;  %v815_v27 = vpop.f32.mrb[74].mxu1  ;;  %v928_v33 = vpop.f32.mrb[74].mxu0  ;;  %v3159_v62 = vmax.f32 %v1704_v21, %v1705_v16  ;;  %v1612_v52 = vadd.f32 %v1592_v0, %v1564_v57 }
 0x1a7   :  { %v1709_v7 = vmax.f32 %v1707_v36, %v1708_v59  ;;  %v1582_v44 = vrot.slane %v808_v46, 2  ;;  %v817_v55 = vpop.f32.mrb[75].mxu1  ;;  %v930_v22 = vpop.f32.mrb[75].mxu0  ;;  %v3164_v39 = vadd.f32 %v920_v1, %v2677_v40  ;;  %v812_v4 = vadd.f32 %v811_v13, %v2660_v49 }
 0x1a8   :  { %3804 = vst [vmem:[#allocation26_spill] sm:$0xff] %v3159_v62  ;;  %v1543_v61 = vsel %vm1188_vm1, %v1533_v23, %v1534_v29  ;;  %v1630_v25 = vrot.slane %v919_v11, 3  ;;  %v1661_v47 = vadd.f32 %v1641_v48, %v1612_v52  ;;  %v925_v23 = vadd.f32 %v924_v5, %v2672_v3 }
 0x1a9   :  { %v1710_v45 = vrot.slane %v1709_v7, 2  ;;  %v1565_v21 = vadd.f32 %v1543_v61, %v2891_v24  ;;  %v1591_v36 = vsel %vm1391_vm4, %v1581_v20, %v1582_v44  ;;  %v1535_v16 = vrot.slane %v812_v4, 1 }
 0x1aa   :  { %v1640_v57 = vsel %vm1635_vm7, %v1629_v63, %v1630_v25  ;;  %v1679_v1 = vsel %vm1669_vm8, %v1661_v47, -inf  ;;  %v814_v46 = vadd.f32 %v813_v41, %v2663_v50  ;;  %v1631_v48 = vrot.slane %v925_v23, 3 }
 0x1ab   :  { %v1711_v59 = vmax.f32 %v1709_v7, %v1710_v45  ;;  %v1613_v13 = vadd.f32 %v1591_v36, %v1565_v21  ;;  %v1714_v0 = vmax.f32 %v1660_v2, %v1679_v1  ;;  %v1542_v24 = vsel %vm1188_vm1, %v1534_v29, %v1535_v16 }
 0x1ac   :  { %v816_v20 = vadd.f32 %v815_v27, %v2660_v49  ;;  %v821_v11 = vpop.f32.mrb[76].mxu1  ;;  %v934_v52 = vpop.f32.mrb[76].mxu0  ;;  %v1566_v5 = vadd.f32 %v1542_v24, %v2904_v10  ;;  %v1583_v7 = vrot.slane %v814_v46, 2  ;;  %v1639_v41 = vsel %vm1635_vm7, %v1630_v25, %v1631_v48 }
 0x1ad   :  { %v1712_v63 = vrot.slane %v1711_v59, 1  ;;  %v1662_v61 = vadd.f32 %v1640_v57, %v1613_v13  ;;  %v823_v4 = vpop.f32.mrb[77].mxu1  ;;  %v936_v45 = vpop.f32.mrb[77].mxu0  ;;  %v1715_v47 = vrot.slane %v1714_v0, 4  ;;  %v818_v21 = vadd.f32 %v817_v55, %v2663_v50 }
 0x1ae   :  { %v1536_v2 = vrot.slane %v816_v20, 1  ;;  %v825_v29 = vpop.f32.mrb[78].mxu1  ;;  %v938_v36 = vpop.f32.mrb[78].mxu0  ;;  %v1590_v27 = vsel %vm1391_vm4, %v1582_v44, %v1583_v7  ;;  %v3189_v57 = vadd.f32 %v926_v56, %v2677_v40  ;;  %v929_v10 = vadd.f32 %v928_v33, %v2672_v3 }
 0x1af   :  { %v3184_v23 = vmax.f32 %v1711_v59, %v1712_v63  ;;  %v827_v1 = vpop.f32.mrb[79].mxu1  ;;  %v940_v13 = vpop.f32.mrb[79].mxu0  ;;  %v1716_v46 = vmax.f32 %v1714_v0, %v1715_v47  ;;  %v1614_v24 = vadd.f32 %v1590_v27, %v1566_v5  ;;  %v1584_v55 = vrot.slane %v818_v21, 2 }
 0x1b0   :  { %v1541_v25 = vsel %vm1188_vm1, %v1535_v16, %v1536_v2  ;;  %v1632_v63 = vrot.slane %v929_v10, 3  ;;  %v3197_v44 = vadd.f32 %v930_v22, %v2677_v40  ;;  %v822_v0 = vadd.f32 %v821_v11, %v2660_v49 }
 0x1b1   :  { %3805 = vst [vmem:[#allocation27_spill] sm:$0xff] %v3184_v23  ;;  %v1567_v59 = vadd.f32 %v1541_v25, %v2924_v51  ;;  %v1717_v56 = vrot.slane %v1716_v46, 2  ;;  %v1663_v34 = vadd.f32 %v1639_v41, %v1614_v24  ;;  %v1589_v33 = vsel %vm1391_vm4, %v1583_v7, %v1584_v55 }
 0x1b2   :  { %v1638_v16 = vsel %vm1635_vm7, %v1631_v48, %v1632_v63  ;;  %v935_v47 = vadd.f32 %v934_v52, %v2672_v3  ;;  %v824_v21 = vadd.f32 %v823_v4, %v2663_v50  ;;  %v1537_v27 = vrot.slane %v822_v0, 1 }
 0x1b3   :  { %v1615_v5 = vadd.f32 %v1589_v33, %v1567_v59  ;;  %v1718_v51 = vmax.f32 %v1716_v46, %v1717_v56  ;;  %v1681_v22 = vsel %vm1669_vm8, %v1663_v34, -inf  ;;  %v3209_v41 = vadd.f32 %v936_v45, %v2677_v40 }
 0x1b4   :  { %v977_v10 = vpop.f32.mrb[80].mxu1  ;;  %v1090_v7 = vpop.f32.mrb[80].mxu0  ;;  %v1721_v24 = vmax.f32 %v1662_v61, %v1681_v22  ;;  %v1633_v25 = vrot.slane %v935_v47, 3  ;;  %v1585_v59 = vrot.slane %v824_v21, 2  ;;  %v1540_v4 = vsel %vm1188_vm1, %v1536_v2, %v1537_v27 }
 0x1b5   :  { %v1664_v11 = vadd.f32 %v1638_v16, %v1615_v5  ;;  %v979_v33 = vpop.f32.mrb[81].mxu1  ;;  %v3211_v48 = vpop.f32.mrb[81].mxu0  ;;  %v1719_v52 = vrot.slane %v1718_v51, 1  ;;  %v826_v46 = vadd.f32 %v825_v29, %v2660_v49  ;;  %v939_v34 = vadd.f32 %v938_v36, %v2672_v3 }
 0x1b6   :  { %v981_v56 = vpop.f32.mrb[82].mxu1  ;;  %v3217_v45 = vpop.f32.mrb[82].mxu0  ;;  %v1722_v0 = vrot.slane %v1721_v24, 4  ;;  %v1568_v61 = vadd.f32 %v1540_v4, %v2930_v30  ;;  %v1637_v5 = vsel %vm1635_vm7, %v1632_v63, %v1633_v25  ;;  %v1588_v16 = vsel %vm1391_vm4, %v1584_v55, %v1585_v59 }
 0x1b7   :  { %v983_v47 = vpop.f32.mrb[83].mxu1  ;;  %v1096_v21 = vpop.f32.mrb[83].mxu0  ;;  %v3224_v22 = vmax.f32 %v1718_v51, %v1719_v52  ;;  %v1538_v2 = vrot.slane %v826_v46, 1  ;;  %v1634_v49 = vrot.slane %v939_v34, 3  ;;  %v828_v3 = vadd.f32 %v827_v1, %v2663_v50 }
 0x1b8   :  { %v1723_v29 = vmax.f32 %v1721_v24, %v1722_v0  ;;  %v1616_v36 = vadd.f32 %v1588_v16, %v1568_v61  ;;  %v3228_v20 = vadd.f32 %v940_v13, %v2677_v40  ;;  %v3231_v30 = vadd.f32 %v977_v10, %v2956_v17 }
 0x1b9   :  { %3806 = vst [vmem:[#allocation28_spill] sm:$0xff] %v3224_v22  ;;  %v1539_v55 = vsel %vm1188_vm1, %v1537_v27, %v1538_v2  ;;  %v3807_v51 = vrot.slane %v2966_v54, 1  ;;  %v1636_v50 = vsel %vm1635_vm7, %v1633_v25, %v1634_v49  ;;  %v3808_v10 = vrot.slane %v2993_v37, 3 }
 0x1ba   :  { %v1724_v1 = vrot.slane %v1723_v29, 2  ;;  %v1665_v24 = vadd.f32 %v1637_v5, %v1616_v36  ;;  %v1569_v40 = vadd.f32 %v1539_v55, %v2938_v53  ;;  %v1586_v27 = vrot.slane %v828_v3, 2 }
 0x1bb   :  { %v1554_v52 = vsel %vm1188_vm1, %v1538_v2, %v3807_v51  ;;  %v1651_v4 = vsel %vm1635_vm7, %v1634_v49, %v3808_v10  ;;  %v3772_v54 = vrot.slane %v3231_v30, 1  ;;  %v3250_v46 = vadd.f32 %v979_v33, %v2963_v26 }
 0x1bc   :  { %v1570_v13 = vadd.f32 %v1554_v52, %v2949_v6  ;;  %v987_v34 = vpop.f32.mrb[84].mxu1  ;;  %v1100_v0 = vpop.f32.mrb[84].mxu0  ;;  %v1725_v25 = vmax.f32 %v1723_v29, %v1724_v1  ;;  %v1683_v61 = vsel %vm1669_vm8, %v1665_v24, -inf  ;;  %v3255_v53 = vadd.f32 %v981_v56, %v2956_v17  ;;  %v2230_v6 = vld [vmem:[#allocation7 + $0x8] sm:$0x3f] }
 0x1bd   :  { %v3809_v37 = vsub.s32 4, %v2564_v38  ;;  %v989_v16 = vpop.f32.mrb[85].mxu1  ;;  %v1102_v2 = vpop.f32.mrb[85].mxu0  ;;  %v1728_v49 = vmax.f32 %v1664_v11, %v1683_v61  ;;  %v1587_v33 = vsel %vm1391_vm4, %v1585_v59, %v1586_v27  ;;  %v3810_v3 = vrot.slane %v2985_v28, 2 }
 0x1be   :  { %v3771_v36 = vrot.slane %v3250_v46, 2  ;;  %v991_v56 = vpop.f32.mrb[86].mxu1  ;;  %v3268_v55 = vpop.f32.mrb[86].mxu0  ;;  %v1726_v51 = vrot.slane %v1725_v25, 1  ;;  %v1617_v52 = vadd.f32 %v1587_v33, %v1569_v40  ;;  %v1768_v24 = vrot.slane %v3255_v53, 1 }
 0x1bf   :  { %v3259_v5 = vrot.slane %v2230_v6, %v3809_v37  ;;  %v1602_v29 = vsel %vm1391_vm4, %v1586_v27, %v3810_v3  ;;  %v993_v10 = vpop.f32.mrb[87].mxu1  ;;  %v3271_v11 = vpop.f32.mrb[87].mxu0  ;;  %v1729_v61 = vrot.slane %v1728_v49, 4  ;;  %v984_v28 = vadd.f32 %v983_v47, %v2963_v26 }
 0x1c0   :  { %v1618_v1 = vadd.f32 %v1602_v29, %v1570_v13  ;;  %v3811_v27 = vsub.s32 5, %v2564_v38  ;;  %v3281_v3 = vmax.f32 %v1725_v25, %v1726_v51  ;;  %v1666_v63 = vadd.f32 %v1636_v50, %v1617_v52 }
 0x1c1   :  { %v3274_v59 = vadd.f32 %v1090_v7, %v3259_v5  ;;  %v1797_v13 = vsel %vm1188_vm1, %v3772_v54, %v1768_v24  ;;  %v1730_v53 = vmax.f32 %v1728_v49, %v1729_v61  ;;  %v1816_v29 = vrot.slane %v984_v28, 2 }
 0x1c2   :  { %v3279_v37 = vrot.slane %v2230_v6, %v3811_v27  ;;  %3812 = vst [vmem:[#allocation29_spill] sm:$0xff] %v3281_v3  ;;  %v1667_v40 = vadd.f32 %v1651_v4, %v1618_v1  ;;  %v1799_v33 = vadd.f32 %v1797_v13, %v2997_v8  ;;  %v1095_v4 = vadd.f32 %v3217_v45, %v3259_v5 }
 0x1c3   :  { %v3776_v7 = vrot.slane %v3274_v59, 3  ;;  %v1731_v25 = vrot.slane %v1730_v53, 2  ;;  %v1845_v8 = vsel %vm1391_vm4, %v3771_v36, %v1816_v29 }
 0x1c4   :  { %v1685_v6 = vsel %vm1669_vm8, %v1667_v40, -inf  ;;  %v3294_v50 = vadd.f32 %v3211_v48, %v3279_v37  ;;  %v1097_v49 = vadd.f32 %v1096_v21, %v3279_v37  ;;  %v997_v52 = vpop.f32.mrb[88].mxu1  ;;  %v1110_v1 = vpop.f32.mrb[88].mxu0  ;;  %v1847_v61 = vadd.f32 %v1845_v8, %v1799_v33 }
 0x1c5   :  { %v1735_v51 = vmax.f32 %v1666_v63, %v1685_v6  ;;  %v1864_v27 = vrot.slane %v1095_v4, 3  ;;  %v999_v48 = vpop.f32.mrb[89].mxu1  ;;  %v3305_v40 = vpop.f32.mrb[89].mxu0  ;;  %v3307_v45 = vmax.f32 %v1730_v53, %v1731_v25  ;;  %v988_v6 = vadd.f32 %v987_v34, %v2956_v17 }
 0x1c6   :  { %3813 = vst [vmem:[#allocation30_spill] sm:$0xff] %v3294_v50  ;;  %v3778_v28 = vrot.slane %v3294_v50, 4  ;;  %v1912_v13 = vrot.slane %v1097_v49, 4  ;;  %v1001_v47 = vpop.f32.mrb[90].mxu1  ;;  %v3310_v36 = vpop.f32.mrb[90].mxu0  ;;  %v1101_v33 = vadd.f32 %v1100_v0, %v3259_v5  ;;  %v990_v4 = vadd.f32 %v989_v16, %v2963_v26 }
 0x1c7   :  { %3814 = vst [vmem:[#allocation31_spill] sm:$0xff] %v3307_v45  ;;  %v1736_v63 = vrot.slane %v1735_v51, 4  ;;  %v1893_v21 = vsel %vm1635_vm7, %v3776_v7, %v1864_v27  ;;  %v1103_v8 = vadd.f32 %v1102_v2, %v3279_v37  ;;  %v1003_v53 = vpop.f32.mrb[91].mxu1  ;;  %v1116_v25 = vpop.f32.mrb[91].mxu0  ;;  %v1769_v22 = vrot.slane %v988_v6, 1 }
 0x1c8   :  { %v1895_v34 = vadd.f32 %v1893_v21, %v1847_v61  ;;  %v1942_v3 = vsel %vm1927_vm9, %v3778_v28, %v1912_v13  ;;  %v1865_v23 = vrot.slane %v1101_v33, 3  ;;  %v1817_v7 = vrot.slane %v990_v4, 2 }
 0x1c9   :  { %v1737_v54 = vmax.f32 %v1735_v51, %v1736_v63  ;;  %v1913_v62 = vrot.slane %v1103_v8, 4  ;;  %v992_v16 = vadd.f32 %v991_v56, %v2956_v17  ;;  %v1796_v2 = vsel %vm1188_vm1, %v1768_v24, %v1769_v22 }
 0x1ca   :  { %v1944_v35 = vadd.f32 %v1942_v3, %v1895_v34  ;;  %v1892_v51 = vsel %vm1635_vm7, %v1864_v27, %v1865_v23  ;;  %v1844_v61 = vsel %vm1391_vm4, %v1816_v29, %v1817_v7  ;;  %v1800_v3 = vadd.f32 %v1796_v2, %v3011_v58 }
 0x1cb   :  { %v1738_v0 = vrot.slane %v1737_v54, 2  ;;  %v1941_v63 = vsel %vm1927_vm9, %v1912_v13, %v1913_v62  ;;  %v1770_v21 = vrot.slane %v992_v16, 1  ;;  %v994_v33 = vadd.f32 %v993_v10, %v2963_v26 }
 0x1cc   :  { %v1007_v56 = vpop.f32.mrb[92].mxu1  ;;  %v3338_v4 = vpop.f32.mrb[92].mxu0  ;;  %v1105_v24 = vadd.f32 %v3268_v55, %v3259_v5  ;;  %v1107_v27 = vadd.f32 %v3271_v11, %v3279_v37  ;;  %v998_v29 = vadd.f32 %v997_v52, %v2956_v17  ;;  %v1111_v13 = vadd.f32 %v1110_v1, %v3259_v5 }
 0x1cd   :  { %v3334_v6 = vmax.f32 %v1737_v54, %v1738_v0  ;;  %v3346_v54 = vpop.f32.mrb[93].mxu1  ;;  %v3348_v8 = vpop.f32.mrb[93].mxu0  ;;  %v1848_v58 = vadd.f32 %v1844_v61, %v1800_v3  ;;  %v1795_v10 = vsel %vm1188_vm1, %v1769_v22, %v1770_v21  ;;  %v1818_v34 = vrot.slane %v994_v33, 2 }
 0x1ce   :  { %v1000_v0 = vadd.f32 %v999_v48, %v2963_v26  ;;  %v3353_v16 = vpop.f32.mrb[94].mxu1  ;;  %v3355_v55 = vpop.f32.mrb[94].mxu0  ;;  %v1801_v11 = vadd.f32 %v1795_v10, %v3041_v42  ;;  %v1866_v52 = vrot.slane %v1105_v24, 3  ;;  %v1914_v2 = vrot.slane %v1107_v27, 4 }
 0x1cf   :  { %3815 = vst [vmem:[#allocation32_spill] sm:$0xff] %v3334_v6  ;;  %v1771_v1 = vrot.slane %v998_v29, 1  ;;  %v3358_v49 = vpop.f32.mrb[95].mxu1  ;;  %v3360_v28 = vpop.f32.mrb[95].mxu0  ;;  %v1896_v61 = vadd.f32 %v1892_v51, %v1848_v58  ;;  %v1843_v22 = vsel %vm1391_vm4, %v1817_v7, %v1818_v34  ;;  %v1867_v3 = vrot.slane %v1111_v13, 3 }
 0x1d0   :  { %v1819_v33 = vrot.slane %v1000_v0, 2  ;;  %v1849_v48 = vadd.f32 %v1843_v22, %v1801_v11  ;;  %v1891_v6 = vsel %vm1635_vm7, %v1865_v23, %v1866_v52  ;;  %v1940_v42 = vsel %vm1927_vm9, %v1913_v62, %v1914_v2 }
 0x1d1   :  { %v1794_v24 = vsel %vm1188_vm1, %v1770_v21, %v1771_v1  ;;  %v1945_v27 = vadd.f32 %v1941_v63, %v1896_v61  ;;  %v1890_v51 = vsel %vm1635_vm7, %v1866_v52, %v1867_v3  ;;  %v1113_v58 = vadd.f32 %v3305_v40, %v3279_v37 }
 0x1d2   :  { %v1802_v29 = vadd.f32 %v1794_v24, %v3047_v31  ;;  %v1842_v7 = vsel %vm1391_vm4, %v1818_v34, %v1819_v33  ;;  %v1897_v13 = vadd.f32 %v1891_v6, %v1849_v48  ;;  %v1002_v23 = vadd.f32 %v1001_v47, %v2956_v17 }
 0x1d3   :  { %v1004_v62 = vadd.f32 %v1003_v53, %v2963_v26  ;;  %v1963_v21 = vsel %vm1961_vm10, %v1945_v27, -inf  ;;  %v1115_v31 = vadd.f32 %v3310_v36, %v3259_v5  ;;  %v1117_v10 = vadd.f32 %v1116_v25, %v3279_v37 }
 0x1d4   :  { %v1850_v63 = vadd.f32 %v1842_v7, %v1802_v29  ;;  %v3384_v0 = vpop.f32.mrb[96].mxu1  ;;  %v3386_v34 = vpop.f32.mrb[96].mxu0  ;;  %v1978_v6 = vmax.f32 %v1944_v35, %v1963_v21  ;;  %v1946_v11 = vadd.f32 %v1940_v42, %v1897_v13  ;;  %v1915_v40 = vrot.slane %v1113_v58, 4 }
 0x1d5   :  { %v1772_v52 = vrot.slane %v1002_v23, 1  ;;  %v3388_v47 = vpop.f32.mrb[97].mxu1  ;;  %v3390_v53 = vpop.f32.mrb[97].mxu0  ;;  %v1820_v22 = vrot.slane %v1004_v62, 2  ;;  %v1868_v48 = vrot.slane %v1115_v31, 3  ;;  %v1916_v24 = vrot.slane %v1117_v10, 4 }
 0x1d6   :  { %v1898_v61 = vadd.f32 %v1890_v51, %v1850_v63  ;;  %v3392_v27 = vpop.f32.mrb[98].mxu1  ;;  %v3394_v36 = vpop.f32.mrb[98].mxu0  ;;  %v1979_v25 = vrot.slane %v1978_v6, 4  ;;  %v1939_v29 = vsel %vm1927_vm9, %v1914_v2, %v1915_v40  ;;  %v1008_v42 = vadd.f32 %v1007_v56, %v2956_v17 }
 0x1d7   :  { %v1793_v35 = vsel %vm1188_vm1, %v1771_v1, %v1772_v52  ;;  %v3401_v7 = vpop.f32.mrb[99].mxu1  ;;  %v3403_v13 = vpop.f32.mrb[99].mxu0  ;;  %v1841_v23 = vsel %vm1391_vm4, %v1819_v33, %v1820_v22  ;;  %v1889_v62 = vsel %vm1635_vm7, %v1867_v3, %v1868_v48  ;;  %v1938_v2 = vsel %vm1927_vm9, %v1915_v40, %v1916_v24 }
 0x1d8   :  { %v1947_v51 = vadd.f32 %v1939_v29, %v1898_v61  ;;  %v1803_v58 = vadd.f32 %v1793_v35, %v3071_v15  ;;  %v1980_v21 = vmax.f32 %v1978_v6, %v1979_v25  ;;  %v1773_v1 = vrot.slane %v1008_v42, 1 }
 0x1d9   :  { %v1121_v56 = vadd.f32 %v3338_v4, %v3259_v5  ;;  %v1010_v15 = vadd.f32 %v3346_v54, %v2963_v26  ;;  %v1123_v33 = vadd.f32 %v3348_v8, %v3279_v37 }
 0x1da   :  { %v1965_v63 = vsel %vm1961_vm10, %v1947_v51, -inf  ;;  %v1851_v31 = vadd.f32 %v1841_v23, %v1803_v58  ;;  %v1981_v10 = vrot.slane %v1980_v21, 2  ;;  %v1792_v6 = vsel %vm1188_vm1, %v1772_v52, %v1773_v1 }
 0x1db   :  { %v1985_v3 = vmax.f32 %v1946_v11, %v1965_v63  ;;  %v1869_v40 = vrot.slane %v1121_v56, 3  ;;  %v1804_v25 = vadd.f32 %v1792_v6, %v3078_v14  ;;  %v1821_v4 = vrot.slane %v1010_v15, 2 }
 0x1dc   :  { %v1899_v61 = vadd.f32 %v1889_v62, %v1851_v31  ;;  %v1917_v29 = vrot.slane %v1123_v33, 4  ;;  %v3423_v35 = vpop.f32.mrb[100].mxu1  ;;  %v3425_v42 = vpop.f32.mrb[100].mxu0  ;;  %v1982_v51 = vmax.f32 %v1980_v21, %v1981_v10  ;;  %v1012_v11 = vadd.f32 %v3353_v16, %v2956_v17 }
 0x1dd   :  { %v1986_v54 = vrot.slane %v1985_v3, 4  ;;  %v1888_v8 = vsel %vm1635_vm7, %v1868_v48, %v1869_v40  ;;  %v3431_v58 = vpop.f32.mrb[101].mxu1  ;;  %v3433_v52 = vpop.f32.mrb[101].mxu0  ;;  %v1840_v14 = vsel %vm1391_vm4, %v1820_v22, %v1821_v4  ;;  %v1014_v21 = vadd.f32 %v3358_v49, %v2963_v26 }
 0x1de   :  { %v1948_v23 = vadd.f32 %v1938_v2, %v1899_v61  ;;  %v1937_v62 = vsel %vm1927_vm9, %v1916_v24, %v1917_v29  ;;  %v3441_v56 = vpop.f32.mrb[102].mxu1  ;;  %v3443_v48 = vpop.f32.mrb[102].mxu0  ;;  %v1983_v63 = vrot.slane %v1982_v51, 1  ;;  %v1852_v31 = vadd.f32 %v1840_v14, %v1804_v25 }
 0x1df   :  { %v1987_v16 = vmax.f32 %v1985_v3, %v1986_v54  ;;  %v1774_v15 = vrot.slane %v1012_v11, 1  ;;  %v3445_v33 = vpop.f32.mrb[103].mxu1  ;;  %v3447_v2 = vpop.f32.mrb[103].mxu0  ;;  %v1822_v10 = vrot.slane %v1014_v21, 2  ;;  %v1125_v22 = vadd.f32 %v3355_v55, %v3259_v5 }
 0x1e0   :  { %v1127_v24 = vadd.f32 %v3360_v28, %v3279_v37  ;;  %v1018_v49 = vadd.f32 %v3384_v0, %v2956_v17  ;;  %v1984_v6 = vmax.f32 %v1982_v51, %v1983_v63  ;;  %v1900_v45 = vadd.f32 %v1888_v8, %v1852_v31 }
 0x1e1   :  { %v1988_v61 = vrot.slane %v1987_v16, 2  ;;  %v1791_v3 = vsel %vm1188_vm1, %v1773_v1, %v1774_v15  ;;  %v1839_v54 = vsel %vm1391_vm4, %v1821_v4, %v1822_v10  ;;  %v1870_v11 = vrot.slane %v1125_v22, 3 }
 0x1e2   :  { %v1805_v25 = vadd.f32 %v1791_v3, %v3095_v18  ;;  %v1918_v14 = vrot.slane %v1127_v24, 4  ;;  %v2034_v55 = vmax.f32 %v1984_v6, 0.0  ;;  %v1949_v12 = vadd.f32 %v1937_v62, %v1900_v45 }
 0x1e3   :  { %v1989_v21 = vmax.f32 %v1987_v16, %v1988_v61  ;;  %v1775_v28 = vrot.slane %v1018_v49, 1  ;;  %v1887_v0 = vsel %vm1635_vm7, %v1869_v40, %v1870_v11  ;;  %v1131_v1 = vadd.f32 %v3386_v34, %v3259_v5 }
 0x1e4   :  { %v1853_v50 = vadd.f32 %v1839_v54, %v1805_v25  ;;  %v1936_v51 = vsel %vm1927_vm9, %v1917_v29, %v1918_v14  ;;  %v3466_v18 = vpop.f32.mrb[104].mxu1  ;;  %v3468_v8 = vpop.f32.mrb[104].mxu0  ;;  %v1967_v63 = vsel %vm1961_vm10, %v1949_v12, -inf  ;;  %v1020_v40 = vadd.f32 %v3388_v47, %v2963_v26 }
 0x1e5   :  { %v1990_v4 = vrot.slane %v1989_v21, 1  ;;  %v1790_v45 = vsel %vm1188_vm1, %v1774_v15, %v1775_v28  ;;  %v3476_v62 = vpop.f32.mrb[105].mxu1  ;;  %v3478_v29 = vpop.f32.mrb[105].mxu0  ;;  %v1992_v16 = vmax.f32 %v1948_v23, %v1967_v63  ;;  %v1871_v22 = vrot.slane %v1131_v1, 3 }
 0x1e6   :  { %v1901_v34 = vadd.f32 %v1887_v0, %v1853_v50  ;;  %v1806_v31 = vadd.f32 %v1790_v45, %v3103_v32  ;;  %v3481_v24 = vpop.f32.mrb[106].mxu1  ;;  %v3483_v49 = vpop.f32.mrb[106].mxu0  ;;  %v1823_v6 = vrot.slane %v1020_v40, 2  ;;  %v1133_v15 = vadd.f32 %v3390_v53, %v3279_v37 }
 0x1e7   :  { %v1991_v12 = vmax.f32 %v1989_v21, %v1990_v4  ;;  %v1022_v47 = vadd.f32 %v3392_v27, %v2956_v17  ;;  %v3489_v61 = vpop.f32.mrb[107].mxu1  ;;  %v3491_v3 = vpop.f32.mrb[107].mxu0  ;;  %v1993_v50 = vrot.slane %v1992_v16, 4  ;;  %v1886_v32 = vsel %vm1635_vm7, %v1870_v11, %v1871_v22 }
 0x1e8   :  { %v1950_v23 = vadd.f32 %v1936_v51, %v1901_v34  ;;  %v1024_v25 = vadd.f32 %v3401_v7, %v2963_v26  ;;  %v1838_v21 = vsel %vm1391_vm4, %v1822_v10, %v1823_v6  ;;  %v1919_v53 = vrot.slane %v1133_v15, 4 }
 0x1e9   :  { %v2035_v54 = vmax.f32 %v1991_v12, 0.0  ;;  %v1776_v0 = vrot.slane %v1022_v47, 1  ;;  %v1994_v1 = vmax.f32 %v1992_v16, %v1993_v50  ;;  %v1854_v27 = vadd.f32 %v1838_v21, %v1806_v31 }
 0x1ea   :  { %v1824_v4 = vrot.slane %v1024_v25, 2  ;;  %v1135_v63 = vadd.f32 %v3394_v36, %v3259_v5  ;;  %v1935_v11 = vsel %vm1927_vm9, %v1918_v14, %v1919_v53  ;;  %v1137_v45 = vadd.f32 %v3403_v13, %v3279_v37 }
 0x1eb   :  { %v2050_v51 = vsel %vm1311_vm3, %v2035_v54, %v2034_v55  ;;  %v1789_v7 = vsel %vm1188_vm1, %v1775_v28, %v1776_v0  ;;  %v1995_v10 = vrot.slane %v1994_v1, 2  ;;  %v1902_v40 = vadd.f32 %v1886_v32, %v1854_v27 }
 0x1ec   :  { %v1807_v16 = vadd.f32 %v1789_v7, %v3125_v9  ;;  %v1837_v34 = vsel %vm1391_vm4, %v1823_v6, %v1824_v4  ;;  %v3511_v31 = vpop.f32.mrb[108].mxu1  ;;  %v3513_v36 = vpop.f32.mrb[108].mxu0  ;;  %v1872_v55 = vrot.slane %v1135_v63, 3  ;;  %v1920_v12 = vrot.slane %v1137_v45, 4 }
 0x1ed   :  { %v1028_v14 = vadd.f32 %v3423_v35, %v2956_v17  ;;  %v1141_v28 = vadd.f32 %v3425_v42, %v3259_v5  ;;  %v3519_v13 = vpop.f32.mrb[109].mxu1  ;;  %v3521_v15 = vpop.f32.mrb[109].mxu0  ;;  %v1996_v9 = vmax.f32 %v1994_v1, %v1995_v10  ;;  %v1951_v47 = vadd.f32 %v1935_v11, %v1902_v40 }
 0x1ee   :  { %v1855_v50 = vadd.f32 %v1837_v34, %v1807_v16  ;;  %v1030_v6 = vadd.f32 %v3431_v58, %v2963_v26  ;;  %v3525_v32 = vpop.f32.mrb[110].mxu1  ;;  %v3527_v25 = vpop.f32.mrb[110].mxu0  ;;  %v1885_v35 = vsel %vm1635_vm7, %v1871_v22, %v1872_v55  ;;  %v1934_v42 = vsel %vm1927_vm9, %v1919_v53, %v1920_v12 }
 0x1ef   :  { %v1777_v54 = vrot.slane %v1028_v14, 1  ;;  %v1873_v21 = vrot.slane %v1141_v28, 3  ;;  %v3533_v27 = vpop.f32.mrb[111].mxu1  ;;  %v3535_v1 = vpop.f32.mrb[111].mxu0  ;;  %v1997_v63 = vrot.slane %v1996_v9, 1  ;;  %v1969_v58 = vsel %vm1961_vm10, %v1951_v47, -inf }
 0x1f0   :  { %v1903_v11 = vadd.f32 %v1885_v35, %v1855_v50  ;;  %v1825_v7 = vrot.slane %v1030_v6, 2  ;;  %v1999_v45 = vmax.f32 %v1950_v23, %v1969_v58  ;;  %v1143_v53 = vadd.f32 %v3433_v52, %v3279_v37 }
 0x1f1   :  { %v1788_v10 = vsel %vm1188_vm1, %v1776_v0, %v1777_v54  ;;  %v1884_v22 = vsel %vm1635_vm7, %v1872_v55, %v1873_v21  ;;  %v1998_v40 = vmax.f32 %v1996_v9, %v1997_v63  ;;  %v1032_v23 = vadd.f32 %v3441_v56, %v2956_v17 }
 0x1f2   :  { %v1952_v16 = vadd.f32 %v1934_v42, %v1903_v11  ;;  %v1808_v34 = vadd.f32 %v1788_v10, %v3129_v43  ;;  %v1836_v14 = vsel %vm1391_vm4, %v1824_v4, %v1825_v7  ;;  %v2000_v28 = vrot.slane %v1999_v45, 4 }
 0x1f3   :  { %v1921_v47 = vrot.slane %v1143_v53, 4  ;;  %v1034_v0 = vadd.f32 %v3445_v33, %v2963_v26  ;;  %v2036_v50 = vmax.f32 %v1998_v40, 0.0  ;;  %v1145_v52 = vadd.f32 %v3443_v48, %v3259_v5 }
 0x1f4   :  { %v1856_v55 = vadd.f32 %v1836_v14, %v1808_v34  ;;  %v1147_v9 = vadd.f32 %v3447_v2, %v3279_v37  ;;  %v2001_v43 = vmax.f32 %v1999_v45, %v2000_v28  ;;  %v1778_v6 = vrot.slane %v1032_v23, 1 }
 0x1f5   :  { %v1933_v4 = vsel %vm1927_vm9, %v1920_v12, %v1921_v47  ;;  %v1826_v35 = vrot.slane %v1034_v0, 2  ;;  %v3559_v42 = vsel %vm1313_vm5, %v2036_v50, %v2050_v51  ;;  %v1874_v63 = vrot.slane %v1145_v52, 3 }
 0x1f6   :  { %v1904_v56 = vadd.f32 %v1884_v22, %v1856_v55  ;;  %v1922_v33 = vrot.slane %v1147_v9, 4  ;;  %v2002_v58 = vrot.slane %v2001_v43, 2  ;;  %v1787_v11 = vsel %vm1188_vm1, %v1777_v54, %v1778_v6 }
 0x1f7   :  { %v1835_v48 = vsel %vm1391_vm4, %v1825_v7, %v1826_v35  ;;  %v1038_v2 = vadd.f32 %v3466_v18, %v2956_v17  ;;  %v1809_v12 = vadd.f32 %v1787_v11, %v3156_v19  ;;  %v1883_v51 = vsel %vm1635_vm7, %v1873_v21, %v1874_v63 }
 0x1f8   :  { %v1953_v45 = vadd.f32 %v1933_v4, %v1904_v56  ;;  %v1932_v10 = vsel %vm1927_vm9, %v1921_v47, %v1922_v33  ;;  %v2003_v22 = vmax.f32 %v2001_v43, %v2002_v58  ;;  %v1151_v54 = vadd.f32 %v3468_v8, %v3259_v5 }
 0x1f9   :  { %v1779_v53 = vrot.slane %v1038_v2, 1  ;;  %v1040_v7 = vadd.f32 %v3476_v62, %v2963_v26  ;;  %v1857_v40 = vadd.f32 %v1835_v48, %v1809_v12  ;;  %v1153_v19 = vadd.f32 %v3478_v29, %v3279_v37 }
 0x1fa   :  { %v1971_v18 = vsel %vm1961_vm10, %v1953_v45, -inf  ;;  %v1042_v21 = vadd.f32 %v3481_v24, %v2956_v17  ;;  %v2004_v34 = vrot.slane %v2003_v22, 1  ;;  %v1875_v47 = vrot.slane %v1151_v54, 3 }
 0x1fb   :  { %v2006_v14 = vmax.f32 %v1952_v16, %v1971_v18  ;;  %v1786_v28 = vsel %vm1188_vm1, %v1778_v6, %v1779_v53  ;;  %v1905_v8 = vadd.f32 %v1883_v51, %v1857_v40  ;;  %v1827_v62 = vrot.slane %v1040_v7, 2 }
 0x1fc   :  { %v1810_v23 = vadd.f32 %v1786_v28, %v3164_v39  ;;  %v1923_v0 = vrot.slane %v1153_v19, 4  ;;  %v3585_v50 = vmax.f32 %v2003_v22, %v2004_v34  ;;  %v1882_v29 = vsel %vm1635_vm7, %v1874_v63, %v1875_v47 }
 0x1fd   :  { %v2007_v55 = vrot.slane %v2006_v14, 4  ;;  %v1780_v52 = vrot.slane %v1042_v21, 1  ;;  %v1954_v9 = vadd.f32 %v1932_v10, %v1905_v8  ;;  %v1834_v24 = vsel %vm1391_vm4, %v1826_v35, %v1827_v62 }
 0x1fe   :  { %v1931_v16 = vsel %vm1927_vm9, %v1922_v33, %v1923_v0  ;;  %v1044_v43 = vadd.f32 %v3489_v61, %v2963_v26  ;;  %v2037_v39 = vmax.f32 %v3585_v50, 0.0  ;;  %v1858_v6 = vadd.f32 %v1834_v24, %v1810_v23 }
 0x1ff   :  { %v2008_v4 = vmax.f32 %v2006_v14, %v2007_v55  ;;  %v1785_v56 = vsel %vm1188_vm1, %v1779_v53, %v1780_v52  ;;  %v1155_v11 = vadd.f32 %v3483_v49, %v3259_v5  ;;  %v1157_v35 = vadd.f32 %v3491_v3, %v3279_v37 }
 0x200   :  { %v1811_v63 = vadd.f32 %v1785_v56, %v3189_v57  ;;  %v1828_v58 = vrot.slane %v1044_v43, 2  ;;  %v1906_v48 = vadd.f32 %v1882_v29, %v1858_v6  ;;  %v1048_v61 = vadd.f32 %v3511_v31, %v2956_v17 }
 0x201   :  { %v2009_v33 = vrot.slane %v2008_v4, 2  ;;  %v1161_v2 = vadd.f32 %v3513_v36, %v3259_v5  ;;  %v1876_v12 = vrot.slane %v1155_v11, 3  ;;  %v1924_v57 = vrot.slane %v1157_v35, 4 }
 0x202   :  { %v1833_v45 = vsel %vm1391_vm4, %v1827_v62, %v1828_v58  ;;  %v1050_v51 = vadd.f32 %v3519_v13, %v2963_v26  ;;  %v1955_v10 = vadd.f32 %v1931_v16, %v1906_v48  ;;  %v1781_v3 = vrot.slane %v1048_v61, 1 }
 0x203   :  { %v2010_v49 = vmax.f32 %v2008_v4, %v2009_v33  ;;  %v1859_v22 = vadd.f32 %v1833_v45, %v1811_v63  ;;  %v1881_v53 = vsel %vm1635_vm7, %v1875_v47, %v1876_v12  ;;  %v1930_v31 = vsel %vm1927_vm9, %v1923_v0, %v1924_v57 }
 0x204   :  { %v1877_v54 = vrot.slane %v1161_v2, 3  ;;  %v1829_v36 = vrot.slane %v1050_v51, 2  ;;  %v1973_v18 = vsel %vm1961_vm10, %v1955_v10, -inf  ;;  %v1784_v13 = vsel %vm1188_vm1, %v1780_v52, %v1781_v3  ;;  %v3819_v2 = vld [vmem:[#allocation30_spill] sm:$0xff] }
 0x205   :  { %v2011_v7 = vrot.slane %v2010_v49, 1  ;;  %v1907_v40 = vadd.f32 %v1881_v53, %v1859_v22  ;;  %v2013_v19 = vmax.f32 %v1954_v9, %v1973_v18  ;;  %v1812_v21 = vadd.f32 %v1784_v13, %v3197_v44  ;;  %v3826_v13 = vld [vmem:[#allocation12_spill] sm:$0xff] }
 0x206   :  { %v1880_v34 = vsel %vm1635_vm7, %v1876_v12, %v1877_v54  ;;  %v1832_v14 = vsel %vm1391_vm4, %v1828_v58, %v1829_v36  ;;  %v1163_v8 = vadd.f32 %v3521_v15, %v3279_v37  ;;  %v1052_v23 = vadd.f32 %v3525_v32, %v2956_v17 }
 0x207   :  { %v3624_v28 = vmax.f32 %v2010_v49, %v2011_v7  ;;  %v1956_v47 = vadd.f32 %v1930_v31, %v1907_v40  ;;  %v2014_v62 = vrot.slane %v2013_v19, 4  ;;  %v1860_v0 = vadd.f32 %v1832_v14, %v1812_v21  ;;  %v3823_v31 = vld [vmem:[#allocation16_spill] sm:$0xff] }
 0x208   :  { %v1165_v44 = vadd.f32 %v3527_v25, %v3259_v5  ;;  %v1054_v55 = vadd.f32 %v3533_v27, %v2963_v26  ;;  %v1925_v52 = vrot.slane %v1163_v8, 4  ;;  %v1782_v9 = vrot.slane %v1052_v23, 1  ;;  %v3828_v8 = vld [vmem:[#allocation13_spill] sm:$0xff] }
 0x209   :  { %v2038_v29 = vmax.f32 %v3624_v28, 0.0  ;;  %v1167_v24 = vadd.f32 %v3535_v1, %v3279_v37  ;;  %v2015_v16 = vmax.f32 %v2013_v19, %v2014_v62  ;;  %v1908_v15 = vadd.f32 %v1880_v34, %v1860_v0  ;;  %v3830_v0 = vld [vmem:[#allocation23_spill] sm:$0xff] }
 0x20a   :  { %v1878_v43 = vrot.slane %v1165_v44, 3  ;;  %v1830_v4 = vrot.slane %v1054_v55, 2  ;;  %v1929_v17 = vsel %vm1927_vm9, %v1924_v57, %v1925_v52  ;;  %v1783_v5 = vsel %vm1188_vm1, %v1781_v3, %v1782_v9  ;;  %v3821_v57 = vld [vmem:[#allocation15_spill] sm:$0xff] }
 0x20b   :  { %v3816_v32 = vrot.slane %v3231_v30, 1  ;;  %v1926_v25 = vrot.slane %v1167_v24, 4  ;;  %v2016_v27 = vrot.slane %v2015_v16, 2  ;;  %v1957_v6 = vadd.f32 %v1929_v17, %v1908_v15  ;;  %v3832_v24 = vld [vmem:[#allocation14_spill] sm:$0xff] }
 0x20c   :  { %v1813_v37 = vadd.f32 %v1783_v5, %v3209_v41  ;;  %v1879_v56 = vsel %vm1635_vm7, %v1877_v54, %v1878_v43  ;;  %v3817_v63 = vrot.slane %v3274_v59, 3  ;;  %v1831_v30 = vsel %vm1391_vm4, %v1829_v36, %v1830_v4  ;;  %v3824_v54 = vld [vmem:[#allocation17_spill] sm:$0xff]  ;;  %v3835_v5 = vld [vmem:[#allocation18_spill] sm:$0xff] }
 0x20d   :  { %v1798_v26 = vsel %vm1188_vm1, %v1782_v9, %v3816_v32  ;;  %v3818_v11 = vrot.slane %v3250_v46, 2  ;;  %v2017_v33 = vmax.f32 %v2015_v16, %v2016_v27  ;;  %v1928_v59 = vsel %vm1927_vm9, %v1925_v52, %v1926_v25  ;;  %v3836_v32 = vld [vmem:[#allocation19_spill] sm:$0xff] }
 0x20e   :  { %v1814_v1 = vadd.f32 %v1798_v26, %v3228_v20  ;;  %v1894_v58 = vsel %vm1635_vm7, %v1878_v43, %v3817_v63  ;;  %v1975_v20 = vsel %vm1961_vm10, %v1957_v6, -inf  ;;  %v1861_v41 = vadd.f32 %v1831_v30, %v1813_v37  ;;  %v3834_v43 = vld [vmem:[#allocation24_spill] sm:$0xff]  ;;  %v3838_v27 = vld [vmem:[#allocation31_spill] sm:$0xff] }
 0x20f   :  { %v1846_v35 = vsel %vm1391_vm4, %v1830_v4, %v3818_v11  ;;  %v2020_v61 = vmax.f32 %v1956_v47, %v1975_v20  ;;  %v3820_v45 = vrot.slane %v3819_v2, 4  ;;  %v3822_v46 = vrot.slane %v3821_v57, 1  ;;  %v3846_v2 = vld [vmem:[#allocation26_spill] sm:$0xff] }
 0x210   :  { %v1862_v48 = vadd.f32 %v1846_v35, %v1814_v1  ;;  %v2018_v49 = vrot.slane %v2017_v33, 1  ;;  %v1909_v10 = vadd.f32 %v1879_v56, %v1861_v41  ;;  %v3825_v36 = vmax.f32 %v3824_v54, 0.0  ;;  %v3842_v35 = vld [vmem:[#allocation21_spill] sm:$0xff]  ;;  %v3844_v41 = vld [vmem:[#allocation32_spill] sm:$0xff] }
 0x211   :  { %v1943_v12 = vsel %vm1927_vm9, %v1926_v25, %v3820_v45  ;;  %v1294_v51 = vmax.f32 %v3821_v57, %v3822_v46  ;;  %v2021_v3 = vrot.slane %v2020_v61, 4  ;;  %v3827_v19 = vmax.f32 %v3826_v13, 0.0  ;;  %v3852_v13 = vld [vmem:[#allocation28_spill] sm:$0xff] }
 0x212   :  { %v1910_v22 = vadd.f32 %v1894_v58, %v1862_v48  ;;  %v1316_v7 = vsel %vm1315_vm11, %v3825_v36, %v3823_v31  ;;  %v2019_v18 = vmax.f32 %v2017_v33, %v2018_v49  ;;  %v1958_v40 = vadd.f32 %v1928_v59, %v1909_v10  ;;  %v3840_v58 = vld [vmem:[#allocation20_spill] sm:$0xff]  ;;  %v3845_v59 = vld [vmem:[#allocation25_spill] sm:$0xff]  ;;  %v3848_v49 = vld [vmem:[#allocation22_spill] sm:$0xff] }
 0x213   :  { %v1302_v53 = vmax.f32 %v1294_v51, 0.0  ;;  %v1318_v21 = vsel %vm1317_vm12, %v3827_v19, %v1316_v7  ;;  %v2022_v34 = vmax.f32 %v2020_v61, %v2021_v3  ;;  %v3829_v23 = vmax.f32 %v3828_v8, 0.0  ;;  %v3850_v31 = vld [vmem:[#allocation27_spill] sm:$0xff] }
 0x214   :  { %v1959_v38 = vadd.f32 %v1943_v12, %v1910_v22  ;;  %v2039_v14 = vmax.f32 %v2019_v18, 0.0  ;;  %v3831_v44 = vrot.slane %v3830_v0, 1  ;;  %v3833_v16 = vmax.f32 %v3832_v24, 0.0 }
 0x215   :  { %v1320_v62 = vsel %vm1319_vm13, %v3829_v23, %v1318_v21  ;;  %v2023_v52 = vrot.slane %v2022_v34, 2  ;;  %v1496_v4 = vrot.slane %v3834_v43, 1  ;;  %v3837_v26 = vmax.f32 %v3836_v32, 0.0 }
 0x216   :  { %v1977_v47 = vsel %vm1961_vm10, %v1959_v38, -inf  ;;  %v1490_v55 = vmax.f32 %v3830_v0, %v3831_v44  ;;  %v1322_v15 = vsel %vm1321_vm14, %v3833_v16, %v1320_v62  ;;  %v3839_v6 = vrot.slane %v3838_v27, 1 }
 0x217   :  { %v2027_v9 = vmax.f32 %v1958_v40, %v1977_v47  ;;  %v1324_v17 = vsel %vm1323_vm15, %v1302_v53, %v1322_v15  ;;  %v1515_v25 = vsel %vm1313_vm5, %v3837_v26, %v3835_v5  ;;  %v2024_v1 = vmax.f32 %v2022_v34, %v2023_v52  ;;  %v3854_v47 = vld [vmem:[#allocation29_spill] sm:$0xff] }
 0x218   :  { %v1504_v60 = vmax.f32 %v1490_v55, 0.0  ;;  %v1734_v37 = vmax.f32 %v3838_v27, %v3839_v6  ;;  %1326 = vst [vmem:[#allocation8] sm:$0xff] %v1324_v17  ;;  %v1497_v63 = vmax.f32 %v3834_v43, %v1496_v4  ;;  %v3841_v30 = vmax.f32 %v3840_v58, 0.0 }
 0x219   :  { %v2028_v56 = vrot.slane %v2027_v9, 4  ;;  %v3843_v33 = vmax.f32 %v3842_v35, 0.0  ;;  %v1740_v48 = vrot.slane %v3844_v41, 1  ;;  %v3847_v45 = vmax.f32 %v3846_v2, 0.0 }
 0x21a   :  { %v1516_v11 = vsel %vm1315_vm11, %v3841_v30, %v1515_v25  ;;  %v1748_v61 = vmax.f32 %v1734_v37, 0.0  ;;  %v2025_v57 = vrot.slane %v2024_v1, 1  ;;  %v1505_v51 = vmax.f32 %v1497_v63, 0.0 }
 0x21b   :  { %v1517_v20 = vsel %vm1317_vm12, %v3843_v33, %v1516_v11  ;;  %v1759_v12 = vsel %vm1313_vm5, %v3847_v45, %v3845_v59  ;;  %v2029_v46 = vmax.f32 %v2027_v9, %v2028_v56  ;;  %v3849_v10 = vmax.f32 %v3848_v49, 0.0 }
 0x21c   :  { %v1741_v53 = vmax.f32 %v3844_v41, %v1740_v48  ;;  %v3851_v54 = vmax.f32 %v3850_v31, 0.0  ;;  %v2052_v7 = vsel %vm1315_vm11, %v2037_v39, %v3559_v42  ;;  %v2026_v18 = vmax.f32 %v2024_v1, %v2025_v57 }
 0x21d   :  { %v1518_v22 = vsel %vm1319_vm13, %v3849_v10, %v1517_v20  ;;  %v2030_v40 = vrot.slane %v2029_v46, 2  ;;  %v3853_v19 = vmax.f32 %v3852_v13, 0.0  ;;  %v3855_v8 = vmax.f32 %v3854_v47, 0.0 }
 0x21e   :  { %v1519_v3 = vsel %vm1321_vm14, %v1504_v60, %v1518_v22  ;;  %v1760_v36 = vsel %vm1315_vm11, %v3851_v54, %v1759_v12  ;;  %v1749_v34 = vmax.f32 %v1741_v53, 0.0  ;;  %v2053_v50 = vsel %vm1317_vm12, %v2038_v29, %v2052_v7 }
 0x21f   :  { %v1520_v38 = vsel %vm1323_vm15, %v1505_v51, %v1519_v3  ;;  %v1761_v21 = vsel %vm1317_vm12, %v3853_v19, %v1760_v36  ;;  %v2040_v62 = vmax.f32 %v2026_v18, 0.0  ;;  %v2031_v42 = vmax.f32 %v2029_v46, %v2030_v40 }
 0x220   :  { %1522 = vst [vmem:[#allocation8 + $0x8] sm:$0xff] %v1520_v38  ;;  %v1762_v23 = vsel %vm1319_vm13, %v3855_v8, %v1761_v21  ;;  %v2054_v0 = vsel %vm1319_vm13, %v2039_v14, %v2053_v50 }
 0x221   :  { %v1763_v39 = vsel %vm1321_vm14, %v1748_v61, %v1762_v23  ;;  %v2032_v55 = vrot.slane %v2031_v42, 1  ;;  %v2055_v52 = vsel %vm1321_vm14, %v2040_v62, %v2054_v0 }
 0x222   :  { %v1764_v44 = vsel %vm1323_vm15, %v1749_v34, %v1763_v39 }
 0x223   :  { %1766 = vst [vmem:[#allocation8 + $0x10] sm:$0xff] %v1764_v44  ;;  %v2033_v9 = vmax.f32 %v2031_v42, %v2032_v55 }
 0x225   :  { %v2041_v24 = vmax.f32 %v2033_v9, 0.0 }
 0x227   :  { %v2056_v28 = vsel %vm1323_vm15, %v2041_v24, %v2055_v52 }
 0x228   :  { %2058 = vst [vmem:[#allocation8 + $0x18] sm:$0xff] %v2056_v28 }
 0x229   :  { %2308 = shalt.err (!%p2305_p0)
}
 0x22a   :  { %s2309_s27 = scalar_lea.hbm %s3751_s3, 512 }
 0x22b   :  { %p2310_p1 = scmp.ne.s32.totalorder %s3751_s3, %s2309_s27  ;;  %p2313_p2 = scmp.lt.u32.totalorder %s2309_s27, %s3751_s3 }
 0x22d   :  { %p2315_p3 = pnand %p2313_p2, %p2310_p1 }
 0x22f   :  { %2318 = shalt.err (!%p2315_p3)
}
 0x230   :  { %2068 = dma.vmem_to_hbm [thread:$0]  %s2066_s23, 512, %s3751_s3, [#allocation4]  }
 0x231   :  { %2323 = dma.done.wait [#allocation4], 512  }
 0x232   :  { %2324 = vsyncadd [#allocation4], 4294966784 }
 0x233   :  { %2072 = vsyncpa [#allocation3], 1 }
 0x234   :  { %2073 = vsyncpa [#allocation6], 1 }
 0x235   :  { %2074 = vsyncpa [#allocation4], 1 }

</bundles_post_ra>
